<compile_context>
chip_gen: v7x
topology: tpu7x:2x2x1
jax: 0.10.0
libtpu: 0.0.40
codegen_flags: <defaults>
</compile_context>

<pallas_src>
import functools
import math

import jax
import jax.numpy as jnp
from jax.experimental import pallas as pl
from jax.experimental.pallas import tpu as pltpu


VMEM_LIMIT = 32 * 1024 * 1024  # safe ceiling on v5e (128 MiB), v6e (128 MiB), v7x (64 MiB)

# Set to jnp.bfloat16 to run matmul operands at MXU bf16 peak (f32 accumulation is kept
# inside the kernels either way); left at f32 to match PyTorch numerics exactly.
COMPUTE_DTYPE = jnp.float32


def _pick_tile(dim, candidates):
    """Largest candidate that exactly divides `dim`; else the full dim (always legal)."""
    for c in candidates:
        if dim % c == 0:
            return c
    # TODO(synk): at real scale (e.g. vocab not a multiple of 128) pad + mask instead of
    # falling back to a whole-dim block.
    return dim


def _tm(dim):
    return _pick_tile(dim, (256, 128, 64, 32, 16, 8))


def _tnk(dim):
    return _pick_tile(dim, (256, 128))


def _params(semantics):
    return pltpu.CompilerParams(dimension_semantics=semantics,
                                vmem_limit_bytes=VMEM_LIMIT)


# ----------------------------- Pallas kernels ------------------------------

def _linear_kernel(x_ref, w_ref, b_ref, o_ref, acc_ref):
    # One (tm, tn) output tile; K is the last ("arbitrary") grid axis.
    k = pl.program_id(2)

    @pl.when(k == 0)
    def _():
        acc_ref[...] = jnp.zeros_like(acc_ref)

    acc_ref[...] += jnp.dot(x_ref[...], w_ref[...],
                            preferred_element_type=jnp.float32)

    @pl.when(k == pl.num_programs(2) - 1)
    def _():
        o_ref[...] = (acc_ref[...] + b_ref[...]).astype(o_ref.dtype)


def linear(x2d, w, b):
    """y = x2d @ w + b  with x2d:[M,K], w:[K,N] (pre-transposed), b:[N]."""
    M, K = x2d.shape
    _, N = w.shape
    tm, tn, tk = _tm(M), _tnk(N), _tnk(K)
    return pl.pallas_call(
        _linear_kernel,
        out_shape=jax.ShapeDtypeStruct((M, N), jnp.float32),
        grid=(M // tm, N // tn, K // tk),
        in_specs=[
            pl.BlockSpec((tm, tk), lambda i, j, k: (i, k)),
            pl.BlockSpec((tk, tn), lambda i, j, k: (k, j)),
            pl.BlockSpec((1, tn), lambda i, j, k: (0, j)),
        ],
        out_specs=pl.BlockSpec((tm, tn), lambda i, j, k: (i, j)),
        scratch_shapes=[pltpu.VMEM((tm, tn), jnp.float32)],
        compiler_params=_params(("parallel", "parallel", "arbitrary")),
    )(x2d.astype(COMPUTE_DTYPE), w.astype(COMPUTE_DTYPE), b.reshape(1, N))


def _linear_res_ln_kernel(x_ref, w_ref, b_ref, r_ref, g_ref, bt_ref, o_ref,
                          acc_ref, *, eps):
    # y = LayerNorm((x @ W + b) + residual) * gamma + beta, full-H output rows.
    k = pl.program_id(1)

    @pl.when(k == 0)
    def _():
        acc_ref[...] = jnp.zeros_like(acc_ref)

    acc_ref[...] += jnp.dot(x_ref[...], w_ref[...],
                            preferred_element_type=jnp.float32)

    @pl.when(k == pl.num_programs(1) - 1)
    def _():
        z = acc_ref[...] + b_ref[...] + r_ref[...]
        mean = jnp.mean(z, axis=-1, keepdims=True)
        var = jnp.mean(jnp.square(z - mean), axis=-1, keepdims=True)
        zn = (z - mean) * jax.lax.rsqrt(var + eps)
        o_ref[...] = (zn * g_ref[...] + bt_ref[...]).astype(o_ref.dtype)


def linear_residual_layernorm(x2d, w, b, residual2d, gamma, beta, eps):
    """LayerNorm(x2d @ w + b + residual2d); x2d:[M,K], w:[K,H], residual2d:[M,H]."""
    M, K = x2d.shape
    _, N = w.shape  # N == H (LayerNorm axis must be fully resident per output tile)
    tm, tk = _tm(M), _tnk(K)
    return pl.pallas_call(
        functools.partial(_linear_res_ln_kernel, eps=eps),
        out_shape=jax.ShapeDtypeStruct((M, N), jnp.float32),
        grid=(M // tm, K // tk),
        in_specs=[
            pl.BlockSpec((tm, tk), lambda i, k: (i, k)),
            pl.BlockSpec((tk, N), lambda i, k: (k, 0)),
            pl.BlockSpec((1, N), lambda i, k: (0, 0)),
            pl.BlockSpec((tm, N), lambda i, k: (i, 0)),
            pl.BlockSpec((1, N), lambda i, k: (0, 0)),
            pl.BlockSpec((1, N), lambda i, k: (0, 0)),
        ],
        out_specs=pl.BlockSpec((tm, N), lambda i, k: (i, 0)),
        scratch_shapes=[pltpu.VMEM((tm, N), jnp.float32)],
        compiler_params=_params(("parallel", "arbitrary")),
    )(x2d.astype(COMPUTE_DTYPE), w.astype(COMPUTE_DTYPE), b.reshape(1, N),
      residual2d, gamma.reshape(1, N), beta.reshape(1, N))


def _attn_kernel(q_ref, k_ref, v_ref, o_ref, *, scale, causal, nheads):
    # q: [1, nH, Sq, Dh]; k/v: [1, nH, Sk, Dh].  All heads of one batch element per step.
    Sq, Sk = q_ref.shape[2], k_ref.shape[2]
    if causal:
        row = jax.lax.broadcasted_iota(jnp.int32, (Sq, Sk), 0)
        col = jax.lax.broadcasted_iota(jnp.int32, (Sq, Sk), 1)
        keep = col <= row
    for h in range(nheads):                       # static unroll: clean 2-D MXU matmuls
        q = q_ref[0, h]                           # (Sq, Dh)
        k = k_ref[0, h]                           # (Sk, Dh)
        v = v_ref[0, h]                           # (Sk, Dh)
        s = jax.lax.dot_general(q, k, (((1,), (1,)), ((), ())),
                                preferred_element_type=jnp.float32) * scale
        if causal:
            s = jnp.where(keep, s, -1e30)         # finite mask: no NaN even if a row masks out
        m = jnp.max(s, axis=-1, keepdims=True)
        p = jnp.exp(s - m)
        denom = jnp.sum(p, axis=-1, keepdims=True)
        attn = p * pl.reciprocal(denom, approx=True)
        o_ref[0, h] = jnp.dot(attn, v, preferred_element_type=jnp.float32)


def attention_core(q, k, v, scale, causal):
    """q:[B,nH,Sq,Dh], k,v:[B,nH,Sk,Dh] -> [B,nH,Sq,Dh]."""
    # TODO(synk): for long sequences convert to a flash-style kernel (Sk grid axis +
    # running max/sum scratch) so VMEM stays O(Sq * tile) instead of O(Sq * Sk).
    B, nH, Sq, Dh = q.shape
    Sk = k.shape[2]
    return pl.pallas_call(
        functools.partial(_attn_kernel, scale=scale, causal=causal, nheads=nH),
        out_shape=jax.ShapeDtypeStruct((B, nH, Sq, Dh), jnp.float32),
        grid=(B,),
        in_specs=[
            pl.BlockSpec((1, nH, Sq, Dh), lambda b: (b, 0, 0, 0)),
            pl.BlockSpec((1, nH, Sk, Dh), lambda b: (b, 0, 0, 0)),
            pl.BlockSpec((1, nH, Sk, Dh), lambda b: (b, 0, 0, 0)),
        ],
        out_specs=pl.BlockSpec((1, nH, Sq, Dh), lambda b: (b, 0, 0, 0)),
        compiler_params=_params(("parallel",)),
    )(q, k, v)


def _add_ln_kernel(x_ref, y_ref, g_ref, b_ref, o_ref, *, eps):
    z = x_ref[...] + y_ref[...]
    mean = jnp.mean(z, axis=-1, keepdims=True)
    var = jnp.mean(jnp.square(z - mean), axis=-1, keepdims=True)
    zn = (z - mean) * jax.lax.rsqrt(var + eps)
    o_ref[...] = zn * g_ref[...] + b_ref[...]


def add_layernorm_rows(x2d, y2d, gamma, beta, eps):
    """LayerNorm(x + y) row-tiled; x2d, y2d: [M, H]."""
    M, H = x2d.shape
    tm = _pick_tile(M, (512, 256, 128, 64, 32, 16, 8))
    return pl.pallas_call(
        functools.partial(_add_ln_kernel, eps=eps),
        out_shape=jax.ShapeDtypeStruct((M, H), jnp.float32),
        grid=(M // tm,),
        in_specs=[
            pl.BlockSpec((tm, H), lambda i: (i, 0)),
            pl.BlockSpec((tm, H), lambda i: (i, 0)),
            pl.BlockSpec((1, H), lambda i: (0, 0)),
            pl.BlockSpec((1, H), lambda i: (0, 0)),
        ],
        out_specs=pl.BlockSpec((tm, H), lambda i: (i, 0)),
        compiler_params=_params(("parallel",)),
    )(x2d, y2d, gamma.reshape(1, H), beta.reshape(1, H))


# ----------------------------- model (glue) --------------------------------

def self_attention_block(x, p, nhead, ln_w, ln_b):
    """self-attn (causal) + out_proj + residual + LayerNorm (norm1)."""
    B, S, E = x.shape
    Dh = E // nhead
    x2d = x.reshape(B * S, E)
    qkv = linear(x2d, p["qkv_w"], p["qkv_b"]).reshape(B, S, 3, nhead, Dh)
    q = qkv[:, :, 0].transpose(0, 2, 1, 3)
    k = qkv[:, :, 1].transpose(0, 2, 1, 3)
    v = qkv[:, :, 2].transpose(0, 2, 1, 3)
    o = attention_core(q, k, v, scale=float(1.0 / math.sqrt(Dh)), causal=True)
    o2d = o.transpose(0, 2, 1, 3).reshape(B * S, E)
    out = linear_residual_layernorm(o2d, p["out_w"], p["out_b"], x2d, ln_w, ln_b, eps=1e-5)
    return out.reshape(B, S, E)


def cross_attention_block(x, mem, p, nhead, ln_w, ln_b):
    """cross-attn + out_proj + residual + LayerNorm (norm2)."""
    B, Sq, E = x.shape
    Sk = mem.shape[1]
    Dh = E // nhead
    x2d = x.reshape(B * Sq, E)
    q = linear(x2d, p["q_w"], p["q_b"]).reshape(B, Sq, nhead, Dh).transpose(0, 2, 1, 3)
    kv = linear(mem.reshape(B * Sk, E), p["kv_w"], p["kv_b"]).reshape(B, Sk, 2, nhead, Dh)
    k = kv[:, :, 0].transpose(0, 2, 1, 3)
    v = kv[:, :, 1].transpose(0, 2, 1, 3)
    o = attention_core(q, k, v, scale=float(1.0 / math.sqrt(Dh)), causal=False)
    o2d = o.transpose(0, 2, 1, 3).reshape(B * Sq, E)
    out = linear_residual_layernorm(o2d, p["out_w"], p["out_b"], x2d, ln_w, ln_b, eps=1e-5)
    return out.reshape(B, Sq, E)


def decoder_block(tgt, enc_out, p, nhead):
    tgt = self_attention_block(tgt, p["self_attn"], nhead, p["norm1_w"], p["norm1_b"])
    tgt = cross_attention_block(tgt, enc_out, p["cross_attn"], nhead,
                                p["norm2_w"], p["norm2_b"])
    B, S, H = tgt.shape
    t2d = tgt.reshape(B * S, H)
    h = linear(t2d, p["linear1_w"], p["linear1_b"])
    # TODO(synk): exact erf-GELU (PyTorch nn.GELU default) kept in JAX glue; erf has no
    # documented Pallas-TPU lowering, so it is not fused into the linear1 epilogue.
    h = jax.nn.gelu(h, approximate=False)
    out = linear_residual_layernorm(h, p["linear2_w"], p["linear2_b"], t2d,
                                    p["norm3_w"], p["norm3_b"], eps=1e-5)
    return out.reshape(B, S, H)


def embed(tokens, params):
    B, S = tokens.shape
    word = jnp.take(params["word_emb"], tokens, axis=0)             # gather stays in glue
    H = word.shape[-1]
    pos = jnp.broadcast_to(params["pos_emb"][:S][None, :, :], word.shape)
    out = add_layernorm_rows(word.reshape(B * S, H), pos.reshape(B * S, H),
                             params["emb_ln_w"], params["emb_ln_b"], eps=1e-12)
    return out.reshape(B, S, H)                                     # dropout = identity (eval)


def transformer_decoder_forward(tokens, enc_out, params, nhead):
    B, S = tokens.shape
    x = embed(tokens, params)
    for lp in params["layers"]:
        x = decoder_block(x, enc_out, lp, nhead)
    H = x.shape[-1]
    logits = linear(x.reshape(B * S, H), params["fc_out_w"], params["fc_out_b"])
    return logits.reshape(B, S, -1)


# --------------------------- deterministic init -----------------------------
# Weights are stored pre-transposed ([in, out]) and with Q/K/V (and K/V) fused, so the
# forward never materializes an HBM transpose.

def init_params(key, num_layers, vocab, H, nhead, dff, pad_token_id, max_pos):
    def norm(k, shape, scale=0.02):
        return (scale * jax.random.normal(k, shape)).astype(jnp.float32)

    keys = jax.random.split(key, 3 + num_layers)
    word_emb = norm(keys[0], (vocab, H)).at[pad_token_id].set(0.0)  # padding_idx row zero
    params = dict(
        word_emb=word_emb,
        pos_emb=norm(keys[1], (max_pos, H)),
        emb_ln_w=jnp.ones((H,), jnp.float32), emb_ln_b=jnp.zeros((H,), jnp.float32),
        fc_out_w=norm(keys[2], (H, vocab)), fc_out_b=jnp.zeros((vocab,), jnp.float32),
        layers=[],
    )
    for l in range(num_layers):
        lk = jax.random.split(keys[3 + l], 7)
        layer = dict(
            self_attn=dict(
                qkv_w=norm(lk[0], (H, 3 * H)), qkv_b=jnp.zeros((3 * H,), jnp.float32),
                out_w=norm(lk[1], (H, H)), out_b=jnp.zeros((H,), jnp.float32),
            ),
            cross_attn=dict(
                q_w=norm(lk[2], (H, H)), q_b=jnp.zeros((H,), jnp.float32),
                kv_w=norm(lk[3], (H, 2 * H)), kv_b=jnp.zeros((2 * H,), jnp.float32),
                out_w=norm(lk[4], (H, H)), out_b=jnp.zeros((H,), jnp.float32),
            ),
            linear1_w=norm(lk[5], (H, dff)), linear1_b=jnp.zeros((dff,), jnp.float32),
            linear2_w=norm(lk[6], (dff, H)), linear2_b=jnp.zeros((H,), jnp.float32),
            norm1_w=jnp.ones((H,), jnp.float32), norm1_b=jnp.zeros((H,), jnp.float32),
            norm2_w=jnp.ones((H,), jnp.float32), norm2_b=jnp.zeros((H,), jnp.float32),
            norm3_w=jnp.ones((H,), jnp.float32), norm3_b=jnp.zeros((H,), jnp.float32),
        )
        params["layers"].append(layer)
    return params


# --------------------------------- main -------------------------------------

if __name__ == "__main__":
    B, S, ENC_S = 2, 8, 8
    HIDDEN, NHEAD, DFF = 32, 4, 64
    VOCAB, NUM_LAYERS, PAD_ID, MAX_POS = 128, 2, 0, 16

    root = jax.random.PRNGKey(0)
    kp, kt, ke = jax.random.split(root, 3)
    params = init_params(kp, NUM_LAYERS, VOCAB, HIDDEN, NHEAD, DFF, PAD_ID, MAX_POS)
    tokens = jax.random.randint(kt, (B, S), 0, VOCAB, dtype=jnp.int32)
    enc_out = jax.random.normal(ke, (B, ENC_S, HIDDEN)).astype(jnp.float32)

    fwd = jax.jit(functools.partial(transformer_decoder_forward, nhead=NHEAD))
    out = fwd(tokens, enc_out, params)
    out = jax.block_until_ready(out)

    assert out.shape == (B, S, VOCAB), out.shape
    assert bool(jnp.all(jnp.isfinite(out)))
    print("KERNEL_OK")
</pallas_src>

<mosaic_0001>
module attributes {stable_mosaic.version = 11 : i64} {
  func.func @_linear_kernel(%arg0: i32, %arg1: i32, %arg2: i32, %arg3: memref<16x32xf32, #tpu.memory_space<vmem>>, %arg4: memref<32x96xf32, #tpu.memory_space<vmem>>, %arg5: memref<1x96xf32, #tpu.memory_space<vmem>>, %arg6: memref<16x96xf32, #tpu.memory_space<vmem>>, %arg7: memref<16x96xf32, #tpu.memory_space<vmem>>) attributes {dimension_semantics = [#tpu.dimension_semantics<parallel>, #tpu.dimension_semantics<parallel>, #tpu.dimension_semantics<arbitrary>], iteration_bounds = array<i64: 1, 1, 1>, scalar_prefetch = 0 : i64, scratch_operands = 1 : i64, tpu.core_type = #tpu.core_type<tc>, window_params = [{transform_indices = @transform_0, window_bounds = array<i64: 16, 32>}, {transform_indices = @transform_1, window_bounds = array<i64: 32, 96>}, {transform_indices = @transform_2, window_bounds = array<i64: 1, 96>}, {transform_indices = @transform_3, window_bounds = array<i64: 16, 96>}]} {
    %c0_i32 = arith.constant 0 : i32
    %0 = arith.cmpi eq, %arg2, %c0_i32 : i32
    %1 = arith.extui %0 : i1 to i32
    %c0_i32_0 = arith.constant 0 : i32
    %2 = arith.cmpi ne, %1, %c0_i32_0 : i32
    scf.if %2 {
      %cst_10 = arith.constant 0.000000e+00 : f32
      %12 = vector.broadcast %cst_10 : f32 to vector<16x96xf32>
      %c0_11 = arith.constant 0 : index
      %c0_12 = arith.constant 0 : index
      %13 = vector.load %arg7[%c0_11, %c0_12] : memref<16x96xf32, #tpu.memory_space<vmem>>, vector<16x96xf32>
      tpu.vector_store %arg7[%c0_11, %c0_12], %12 {strides = array<i32>} : memref<16x96xf32, #tpu.memory_space<vmem>>, vector<16x96xf32>,
    } else {
    }
    %c0 = arith.constant 0 : index
    %c0_1 = arith.constant 0 : index
    %3 = vector.load %arg7[%c0, %c0_1] : memref<16x96xf32, #tpu.memory_space<vmem>>, vector<16x96xf32>
    %c0_2 = arith.constant 0 : index
    %c0_3 = arith.constant 0 : index
    %4 = vector.load %arg3[%c0_2, %c0_3] : memref<16x32xf32, #tpu.memory_space<vmem>>, vector<16x32xf32>
    %c0_4 = arith.constant 0 : index
    %c0_5 = arith.constant 0 : index
    %5 = vector.load %arg4[%c0_4, %c0_5] : memref<32x96xf32, #tpu.memory_space<vmem>>, vector<32x96xf32>
    %cst = arith.constant dense<0.000000e+00> : vector<16x96xf32>
    %6 = tpu.matmul %4, %5, %cst {dimension_numbers = #tpu.dot_dimension_numbers<[1], [0], [0], [1], [0, 0, 1, 1], [], []>} : vector<16x32xf32>, vector<32x96xf32>, vector<16x96xf32> -> vector<16x96xf32>
    %7 = arith.addf %3, %6 : vector<16x96xf32>
    %c0_6 = arith.constant 0 : index
    %c0_7 = arith.constant 0 : index
    %8 = vector.load %arg7[%c0_6, %c0_7] : memref<16x96xf32, #tpu.memory_space<vmem>>, vector<16x96xf32>
    tpu.vector_store %arg7[%c0_6, %c0_7], %7 {strides = array<i32>} : memref<16x96xf32, #tpu.memory_space<vmem>>, vector<16x96xf32>,
    %c0_i32_8 = arith.constant 0 : i32
    %9 = arith.cmpi eq, %arg2, %c0_i32_8 : i32
    %10 = arith.extui %9 : i1 to i32
    %c0_i32_9 = arith.constant 0 : i32
    %11 = arith.cmpi ne, %10, %c0_i32_9 : i32
    scf.if %11 {
      %c0_10 = arith.constant 0 : index
      %c0_11 = arith.constant 0 : index
      %12 = vector.load %arg7[%c0_10, %c0_11] : memref<16x96xf32, #tpu.memory_space<vmem>>, vector<16x96xf32>
      %c0_12 = arith.constant 0 : index
      %c0_13 = arith.constant 0 : index
      %13 = vector.load %arg5[%c0_12, %c0_13] : memref<1x96xf32, #tpu.memory_space<vmem>>, vector<1x96xf32>
      %14 = vector.broadcast %13 : vector<1x96xf32> to vector<16x96xf32>
      %15 = arith.addf %12, %14 : vector<16x96xf32>
      %c0_14 = arith.constant 0 : index
      %c0_15 = arith.constant 0 : index
      %16 = vector.load %arg6[%c0_14, %c0_15] : memref<16x96xf32, #tpu.memory_space<vmem>>, vector<16x96xf32>
      tpu.vector_store %arg6[%c0_14, %c0_15], %15 {strides = array<i32>} : memref<16x96xf32, #tpu.memory_space<vmem>>, vector<16x96xf32>,
    } else {
    }
    return
  }
  func.func @transform_0(%arg0: i32, %arg1: i32, %arg2: i32) -> (i32, i32) {
    %c0_i32 = arith.constant 0 : i32
    return %arg0, %arg2 : i32, i32
  }
  func.func @transform_1(%arg0: i32, %arg1: i32, %arg2: i32) -> (i32, i32) {
    %c0_i32 = arith.constant 0 : i32
    return %arg2, %arg1 : i32, i32
  }
  func.func @transform_2(%arg0: i32, %arg1: i32, %arg2: i32) -> (i32, i32) {
    %c0_i32 = arith.constant 0 : i32
    %c0_i32_0 = arith.constant 0 : i32
    return %c0_i32, %arg1 : i32, i32
  }
  func.func @transform_3(%arg0: i32, %arg1: i32, %arg2: i32) -> (i32, i32) {
    %c0_i32 = arith.constant 0 : i32
    return %arg0, %arg1 : i32, i32
  }
}

module attributes {stable_mosaic.version = 11 : i64} {
  func.func @_add_ln_kernel(%arg0: i32, %arg1: memref<16x32xf32, #tpu.memory_space<vmem>>, %arg2: memref<16x32xf32, #tpu.memory_space<vmem>>, %arg3: memref<1x32xf32, #tpu.memory_space<vmem>>, %arg4: memref<1x32xf32, #tpu.memory_space<vmem>>, %arg5: memref<16x32xf32, #tpu.memory_space<vmem>>) attributes {dimension_semantics = [#tpu.dimension_semantics<parallel>], iteration_bounds = array<i64: 1>, scalar_prefetch = 0 : i64, scratch_operands = 0 : i64, tpu.core_type = #tpu.core_type<tc>, window_params = [{transform_indices = @transform_0, window_bounds = array<i64: 16, 32>}, {transform_indices = @transform_1, window_bounds = array<i64: 16, 32>}, {pipeline_mode = #tpu.pipeline_mode<synchronous>, transform_indices = @transform_2, window_bounds = array<i64: 1, 32>}, {pipeline_mode = #tpu.pipeline_mode<synchronous>, transform_indices = @transform_3, window_bounds = array<i64: 1, 32>}, {transform_indices = @transform_4, window_bounds = array<i64: 16, 32>}]} {
    %c0 = arith.constant 0 : index
    %c0_0 = arith.constant 0 : index
    %0 = vector.load %arg1[%c0, %c0_0] : memref<16x32xf32, #tpu.memory_space<vmem>>, vector<16x32xf32>
    %c0_1 = arith.constant 0 : index
    %c0_2 = arith.constant 0 : index
    %1 = vector.load %arg2[%c0_1, %c0_2] : memref<16x32xf32, #tpu.memory_space<vmem>>, vector<16x32xf32>
    %2 = arith.addf %0, %1 : vector<16x32xf32>
    %cst = arith.constant dense<0.000000e+00> : vector<16xf32>
    %3 = vector.multi_reduction <add>, %2, %cst [1] : vector<16x32xf32> to vector<16xf32>
    %4 = vector.shape_cast %3 : vector<16xf32> to vector<16x1xf32>
    %cst_3 = arith.constant 3.200000e+01 : f32
    %5 = vector.broadcast %cst_3 : f32 to vector<16x1xf32>
    %6 = arith.divf %4, %5 : vector<16x1xf32>
    %7 = vector.broadcast %6 : vector<16x1xf32> to vector<16x32xf32>
    %8 = arith.subf %2, %7 : vector<16x32xf32>
    %9 = arith.mulf %8, %8 : vector<16x32xf32>
    %cst_4 = arith.constant dense<0.000000e+00> : vector<16xf32>
    %10 = vector.multi_reduction <add>, %9, %cst_4 [1] : vector<16x32xf32> to vector<16xf32>
    %11 = vector.shape_cast %10 : vector<16xf32> to vector<16x1xf32>
    %cst_5 = arith.constant 3.200000e+01 : f32
    %12 = vector.broadcast %cst_5 : f32 to vector<16x1xf32>
    %13 = arith.divf %11, %12 : vector<16x1xf32>
    %14 = vector.broadcast %6 : vector<16x1xf32> to vector<16x32xf32>
    %15 = arith.subf %2, %14 : vector<16x32xf32>
    %cst_6 = arith.constant 9.99999996E-13 : f32
    %16 = vector.broadcast %cst_6 : f32 to vector<16x1xf32>
    %17 = arith.addf %13, %16 : vector<16x1xf32>
    %18 = math.rsqrt %17 : vector<16x1xf32>
    %19 = vector.broadcast %18 : vector<16x1xf32> to vector<16x32xf32>
    %20 = arith.mulf %15, %19 : vector<16x32xf32>
    %c0_7 = arith.constant 0 : index
    %c0_8 = arith.constant 0 : index
    %21 = vector.load %arg3[%c0_7, %c0_8] : memref<1x32xf32, #tpu.memory_space<vmem>>, vector<1x32xf32>
    %22 = vector.broadcast %21 : vector<1x32xf32> to vector<16x32xf32>
    %23 = arith.mulf %20, %22 : vector<16x32xf32>
    %c0_9 = arith.constant 0 : index
    %c0_10 = arith.constant 0 : index
    %24 = vector.load %arg4[%c0_9, %c0_10] : memref<1x32xf32, #tpu.memory_space<vmem>>, vector<1x32xf32>
    %25 = vector.broadcast %24 : vector<1x32xf32> to vector<16x32xf32>
    %26 = arith.addf %23, %25 : vector<16x32xf32>
    %c0_11 = arith.constant 0 : index
    %c0_12 = arith.constant 0 : index
    %27 = vector.load %arg5[%c0_11, %c0_12] : memref<16x32xf32, #tpu.memory_space<vmem>>, vector<16x32xf32>
    tpu.vector_store %arg5[%c0_11, %c0_12], %26 {strides = array<i32>} : memref<16x32xf32, #tpu.memory_space<vmem>>, vector<16x32xf32>,
    return
  }
  func.func @transform_0(%arg0: i32) -> (i32, i32) {
    %c0_i32 = arith.constant 0 : i32
    %c0_i32_0 = arith.constant 0 : i32
    return %arg0, %c0_i32 : i32, i32
  }
  func.func @transform_1(%arg0: i32) -> (i32, i32) {
    %c0_i32 = arith.constant 0 : i32
    %c0_i32_0 = arith.constant 0 : i32
    return %arg0, %c0_i32 : i32, i32
  }
  func.func @transform_2(%arg0: i32) -> (i32, i32) {
    %c0_i32 = arith.constant 0 : i32
    %c0_i32_0 = arith.constant 0 : i32
    %c0_i32_1 = arith.constant 0 : i32
    return %c0_i32, %c0_i32_0 : i32, i32
  }
  func.func @transform_3(%arg0: i32) -> (i32, i32) {
    %c0_i32 = arith.constant 0 : i32
    %c0_i32_0 = arith.constant 0 : i32
    %c0_i32_1 = arith.constant 0 : i32
    return %c0_i32, %c0_i32_0 : i32, i32
  }
  func.func @transform_4(%arg0: i32) -> (i32, i32) {
    %c0_i32 = arith.constant 0 : i32
    %c0_i32_0 = arith.constant 0 : i32
    return %arg0, %c0_i32 : i32, i32
  }
}

module attributes {stable_mosaic.version = 11 : i64} {
  func.func @_attn_kernel(%arg0: i32, %arg1: memref<1x4x8x8xf32, #tpu.memory_space<vmem>>, %arg2: memref<1x4x8x8xf32, #tpu.memory_space<vmem>>, %arg3: memref<1x4x8x8xf32, #tpu.memory_space<vmem>>, %arg4: memref<1x4x8x8xf32, #tpu.memory_space<vmem>>) attributes {dimension_semantics = [#tpu.dimension_semantics<parallel>], iteration_bounds = array<i64: 2>, scalar_prefetch = 0 : i64, scratch_operands = 0 : i64, tpu.core_type = #tpu.core_type<tc>, window_params = [{transform_indices = @transform_0, window_bounds = array<i64: 1, 4, 8, 8>}, {transform_indices = @transform_1, window_bounds = array<i64: 1, 4, 8, 8>}, {transform_indices = @transform_2, window_bounds = array<i64: 1, 4, 8, 8>}, {transform_indices = @transform_3, window_bounds = array<i64: 1, 4, 8, 8>}]} {
    %0 = tpu.iota {dimensions = array<i32: 0>} : vector<8x8xi32>
    %1 = tpu.iota {dimensions = array<i32: 1>} : vector<8x8xi32>
    %2 = arith.cmpi sle, %1, %0 : vector<8x8xi32>
    %c0 = arith.constant 0 : index
    %c0_0 = arith.constant 0 : index
    %c0_1 = arith.constant 0 : index
    %c0_2 = arith.constant 0 : index
    %3 = vector.load %arg1[%c0, %c0_0, %c0_1, %c0_2] : memref<1x4x8x8xf32, #tpu.memory_space<vmem>>, vector<1x1x8x8xf32>
    %4 = vector.shape_cast %3 : vector<1x1x8x8xf32> to vector<8x8xf32>
    %c0_3 = arith.constant 0 : index
    %c0_4 = arith.constant 0 : index
    %c0_5 = arith.constant 0 : index
    %c0_6 = arith.constant 0 : index
    %5 = vector.load %arg2[%c0_3, %c0_4, %c0_5, %c0_6] : memref<1x4x8x8xf32, #tpu.memory_space<vmem>>, vector<1x1x8x8xf32>
    %6 = vector.shape_cast %5 : vector<1x1x8x8xf32> to vector<8x8xf32>
    %c0_7 = arith.constant 0 : index
    %c0_8 = arith.constant 0 : index
    %c0_9 = arith.constant 0 : index
    %c0_10 = arith.constant 0 : index
    %7 = vector.load %arg3[%c0_7, %c0_8, %c0_9, %c0_10] : memref<1x4x8x8xf32, #tpu.memory_space<vmem>>, vector<1x1x8x8xf32>
    %8 = vector.shape_cast %7 : vector<1x1x8x8xf32> to vector<8x8xf32>
    %cst = arith.constant dense<0.000000e+00> : vector<8x8xf32>
    %9 = tpu.matmul %4, %6, %cst {dimension_numbers = #tpu.dot_dimension_numbers<[1], [1], [0], [0], [0, 0, 1, 0], [], []>} : vector<8x8xf32>, vector<8x8xf32>, vector<8x8xf32> -> vector<8x8xf32>
    %cst_11 = arith.constant 0.353553385 : f32
    %10 = vector.broadcast %cst_11 : f32 to vector<8x8xf32>
    %11 = arith.mulf %9, %10 : vector<8x8xf32>
    %cst_12 = arith.constant -1.000000e+30 : f32
    %12 = vector.broadcast %cst_12 : f32 to vector<8x8xf32>
    %13 = arith.select %2, %11, %12 : vector<8x8xi1>, vector<8x8xf32>
    %cst_13 = arith.constant dense<0xFF800000> : vector<8xf32>
    %14 = vector.multi_reduction <maximumf>, %13, %cst_13 [1] : vector<8x8xf32> to vector<8xf32>
    %15 = vector.shape_cast %14 : vector<8xf32> to vector<8x1xf32>
    %16 = vector.broadcast %15 : vector<8x1xf32> to vector<8x8xf32>
    %17 = arith.subf %13, %16 : vector<8x8xf32>
    %18 = math.exp %17 : vector<8x8xf32>
    %cst_14 = arith.constant dense<0.000000e+00> : vector<8xf32>
    %19 = vector.multi_reduction <add>, %18, %cst_14 [1] : vector<8x8xf32> to vector<8xf32>
    %20 = vector.shape_cast %19 : vector<8xf32> to vector<8x1xf32>
    %21 = tpu.reciprocal %20 {approx = true} : vector<8x1xf32> -> vector<8x1xf32>
    %22 = vector.broadcast %21 : vector<8x1xf32> to vector<8x8xf32>
    %23 = arith.mulf %18, %22 : vector<8x8xf32>
    %cst_15 = arith.constant dense<0.000000e+00> : vector<8x8xf32>
    %24 = tpu.matmul %23, %8, %cst_15 {dimension_numbers = #tpu.dot_dimension_numbers<[1], [0], [0], [1], [0, 0, 1, 1], [], []>} : vector<8x8xf32>, vector<8x8xf32>, vector<8x8xf32> -> vector<8x8xf32>
    %c0_16 = arith.constant 0 : index
    %c0_17 = arith.constant 0 : index
    %c0_18 = arith.constant 0 : index
    %c0_19 = arith.constant 0 : index
    %25 = vector.load %arg4[%c0_16, %c0_17, %c0_18, %c0_19] : memref<1x4x8x8xf32, #tpu.memory_space<vmem>>, vector<1x1x8x8xf32>
    %26 = vector.shape_cast %25 : vector<1x1x8x8xf32> to vector<8x8xf32>
    %27 = vector.shape_cast %24 : vector<8x8xf32> to vector<1x1x8x8xf32>
    tpu.vector_store %arg4[%c0_16, %c0_17, %c0_18, %c0_19], %27 {strides = array<i32>} : memref<1x4x8x8xf32, #tpu.memory_space<vmem>>, vector<1x1x8x8xf32>,
    %c0_20 = arith.constant 0 : index
    %c1 = arith.constant 1 : index
    %c0_21 = arith.constant 0 : index
    %c0_22 = arith.constant 0 : index
    %28 = vector.load %arg1[%c0_20, %c1, %c0_21, %c0_22] : memref<1x4x8x8xf32, #tpu.memory_space<vmem>>, vector<1x1x8x8xf32>
    %29 = vector.shape_cast %28 : vector<1x1x8x8xf32> to vector<8x8xf32>
    %c0_23 = arith.constant 0 : index
    %c1_24 = arith.constant 1 : index
    %c0_25 = arith.constant 0 : index
    %c0_26 = arith.constant 0 : index
    %30 = vector.load %arg2[%c0_23, %c1_24, %c0_25, %c0_26] : memref<1x4x8x8xf32, #tpu.memory_space<vmem>>, vector<1x1x8x8xf32>
    %31 = vector.shape_cast %30 : vector<1x1x8x8xf32> to vector<8x8xf32>
    %c0_27 = arith.constant 0 : index
    %c1_28 = arith.constant 1 : index
    %c0_29 = arith.constant 0 : index
    %c0_30 = arith.constant 0 : index
    %32 = vector.load %arg3[%c0_27, %c1_28, %c0_29, %c0_30] : memref<1x4x8x8xf32, #tpu.memory_space<vmem>>, vector<1x1x8x8xf32>
    %33 = vector.shape_cast %32 : vector<1x1x8x8xf32> to vector<8x8xf32>
    %cst_31 = arith.constant dense<0.000000e+00> : vector<8x8xf32>
    %34 = tpu.matmul %29, %31, %cst_31 {dimension_numbers = #tpu.dot_dimension_numbers<[1], [1], [0], [0], [0, 0, 1, 0], [], []>} : vector<8x8xf32>, vector<8x8xf32>, vector<8x8xf32> -> vector<8x8xf32>
    %cst_32 = arith.constant 0.353553385 : f32
    %35 = vector.broadcast %cst_32 : f32 to vector<8x8xf32>
    %36 = arith.mulf %34, %35 : vector<8x8xf32>
    %cst_33 = arith.constant -1.000000e+30 : f32
    %37 = vector.broadcast %cst_33 : f32 to vector<8x8xf32>
    %38 = arith.select %2, %36, %37 : vector<8x8xi1>, vector<8x8xf32>
    %cst_34 = arith.constant dense<0xFF800000> : vector<8xf32>
    %39 = vector.multi_reduction <maximumf>, %38, %cst_34 [1] : vector<8x8xf32> to vector<8xf32>
    %40 = vector.shape_cast %39 : vector<8xf32> to vector<8x1xf32>
    %41 = vector.broadcast %40 : vector<8x1xf32> to vector<8x8xf32>
    %42 = arith.subf %38, %41 : vector<8x8xf32>
    %43 = math.exp %42 : vector<8x8xf32>
    %cst_35 = arith.constant dense<0.000000e+00> : vector<8xf32>
    %44 = vector.multi_reduction <add>, %43, %cst_35 [1] : vector<8x8xf32> to vector<8xf32>
    %45 = vector.shape_cast %44 : vector<8xf32> to vector<8x1xf32>
    %46 = tpu.reciprocal %45 {approx = true} : vector<8x1xf32> -> vector<8x1xf32>
    %47 = vector.broadcast %46 : vector<8x1xf32> to vector<8x8xf32>
    %48 = arith.mulf %43, %47 : vector<8x8xf32>
    %cst_36 = arith.constant dense<0.000000e+00> : vector<8x8xf32>
    %49 = tpu.matmul %48, %33, %cst_36 {dimension_numbers = #tpu.dot_dimension_numbers<[1], [0], [0], [1], [0, 0, 1, 1], [], []>} : vector<8x8xf32>, vector<8x8xf32>, vector<8x8xf32> -> vector<8x8xf32>
    %c0_37 = arith.constant 0 : index
    %c1_38 = arith.constant 1 : index
    %c0_39 = arith.constant 0 : index
    %c0_40 = arith.constant 0 : index
    %50 = vector.load %arg4[%c0_37, %c1_38, %c0_39, %c0_40] : memref<1x4x8x8xf32, #tpu.memory_space<vmem>>, vector<1x1x8x8xf32>
    %51 = vector.shape_cast %50 : vector<1x1x8x8xf32> to vector<8x8xf32>
    %52 = vector.shape_cast %49 : vector<8x8xf32> to vector<1x1x8x8xf32>
    tpu.vector_store %arg4[%c0_37, %c1_38, %c0_39, %c0_40], %52 {strides = array<i32>} : memref<1x4x8x8xf32, #tpu.memory_space<vmem>>, vector<1x1x8x8xf32>,
    %c0_41 = arith.constant 0 : index
    %c2 = arith.constant 2 : index
    %c0_42 = arith.constant 0 : index
    %c0_43 = arith.constant 0 : index
    %53 = vector.load %arg1[%c0_41, %c2, %c0_42, %c0_43] : memref<1x4x8x8xf32, #tpu.memory_space<vmem>>, vector<1x1x8x8xf32>
    %54 = vector.shape_cast %53 : vector<1x1x8x8xf32> to vector<8x8xf32>
    %c0_44 = arith.constant 0 : index
    %c2_45 = arith.constant 2 : index
    %c0_46 = arith.constant 0 : index
    %c0_47 = arith.constant 0 : index
    %55 = vector.load %arg2[%c0_44, %c2_45, %c0_46, %c0_47] : memref<1x4x8x8xf32, #tpu.memory_space<vmem>>, vector<1x1x8x8xf32>
    %56 = vector.shape_cast %55 : vector<1x1x8x8xf32> to vector<8x8xf32>
    %c0_48 = arith.constant 0 : index
    %c2_49 = arith.constant 2 : index
    %c0_50 = arith.constant 0 : index
    %c0_51 = arith.constant 0 : index
    %57 = vector.load %arg3[%c0_48, %c2_49, %c0_50, %c0_51] : memref<1x4x8x8xf32, #tpu.memory_space<vmem>>, vector<1x1x8x8xf32>
    %58 = vector.shape_cast %57 : vector<1x1x8x8xf32> to vector<8x8xf32>
    %cst_52 = arith.constant dense<0.000000e+00> : vector<8x8xf32>
    %59 = tpu.matmul %54, %56, %cst_52 {dimension_numbers = #tpu.dot_dimension_numbers<[1], [1], [0], [0], [0, 0, 1, 0], [], []>} : vector<8x8xf32>, vector<8x8xf32>, vector<8x8xf32> -> vector<8x8xf32>
    %cst_53 = arith.constant 0.353553385 : f32
    %60 = vector.broadcast %cst_53 : f32 to vector<8x8xf32>
    %61 = arith.mulf %59, %60 : vector<8x8xf32>
    %cst_54 = arith.constant -1.000000e+30 : f32
    %62 = vector.broadcast %cst_54 : f32 to vector<8x8xf32>
    %63 = arith.select %2, %61, %62 : vector<8x8xi1>, vector<8x8xf32>
    %cst_55 = arith.constant dense<0xFF800000> : vector<8xf32>
    %64 = vector.multi_reduction <maximumf>, %63, %cst_55 [1] : vector<8x8xf32> to vector<8xf32>
    %65 = vector.shape_cast %64 : vector<8xf32> to vector<8x1xf32>
    %66 = vector.broadcast %65 : vector<8x1xf32> to vector<8x8xf32>
    %67 = arith.subf %63, %66 : vector<8x8xf32>
    %68 = math.exp %67 : vector<8x8xf32>
    %cst_56 = arith.constant dense<0.000000e+00> : vector<8xf32>
    %69 = vector.multi_reduction <add>, %68, %cst_56 [1] : vector<8x8xf32> to vector<8xf32>
    %70 = vector.shape_cast %69 : vector<8xf32> to vector<8x1xf32>
    %71 = tpu.reciprocal %70 {approx = true} : vector<8x1xf32> -> vector<8x1xf32>
    %72 = vector.broadcast %71 : vector<8x1xf32> to vector<8x8xf32>
    %73 = arith.mulf %68, %72 : vector<8x8xf32>
    %cst_57 = arith.constant dense<0.000000e+00> : vector<8x8xf32>
    %74 = tpu.matmul %73, %58, %cst_57 {dimension_numbers = #tpu.dot_dimension_numbers<[1], [0], [0], [1], [0, 0, 1, 1], [], []>} : vector<8x8xf32>, vector<8x8xf32>, vector<8x8xf32> -> vector<8x8xf32>
    %c0_58 = arith.constant 0 : index
    %c2_59 = arith.constant 2 : index
    %c0_60 = arith.constant 0 : index
    %c0_61 = arith.constant 0 : index
    %75 = vector.load %arg4[%c0_58, %c2_59, %c0_60, %c0_61] : memref<1x4x8x8xf32, #tpu.memory_space<vmem>>, vector<1x1x8x8xf32>
    %76 = vector.shape_cast %75 : vector<1x1x8x8xf32> to vector<8x8xf32>
    %77 = vector.shape_cast %74 : vector<8x8xf32> to vector<1x1x8x8xf32>
    tpu.vector_store %arg4[%c0_58, %c2_59, %c0_60, %c0_61], %77 {strides = array<i32>} : memref<1x4x8x8xf32, #tpu.memory_space<vmem>>, vector<1x1x8x8xf32>,
    %c0_62 = arith.constant 0 : index
    %c3 = arith.constant 3 : index
    %c0_63 = arith.constant 0 : index
    %c0_64 = arith.constant 0 : index
    %78 = vector.load %arg1[%c0_62, %c3, %c0_63, %c0_64] : memref<1x4x8x8xf32, #tpu.memory_space<vmem>>, vector<1x1x8x8xf32>
    %79 = vector.shape_cast %78 : vector<1x1x8x8xf32> to vector<8x8xf32>
    %c0_65 = arith.constant 0 : index
    %c3_66 = arith.constant 3 : index
    %c0_67 = arith.constant 0 : index
    %c0_68 = arith.constant 0 : index
    %80 = vector.load %arg2[%c0_65, %c3_66, %c0_67, %c0_68] : memref<1x4x8x8xf32, #tpu.memory_space<vmem>>, vector<1x1x8x8xf32>
    %81 = vector.shape_cast %80 : vector<1x1x8x8xf32> to vector<8x8xf32>
    %c0_69 = arith.constant 0 : index
    %c3_70 = arith.constant 3 : index
    %c0_71 = arith.constant 0 : index
    %c0_72 = arith.constant 0 : index
    %82 = vector.load %arg3[%c0_69, %c3_70, %c0_71, %c0_72] : memref<1x4x8x8xf32, #tpu.memory_space<vmem>>, vector<1x1x8x8xf32>
    %83 = vector.shape_cast %82 : vector<1x1x8x8xf32> to vector<8x8xf32>
    %cst_73 = arith.constant dense<0.000000e+00> : vector<8x8xf32>
    %84 = tpu.matmul %79, %81, %cst_73 {dimension_numbers = #tpu.dot_dimension_numbers<[1], [1], [0], [0], [0, 0, 1, 0], [], []>} : vector<8x8xf32>, vector<8x8xf32>, vector<8x8xf32> -> vector<8x8xf32>
    %cst_74 = arith.constant 0.353553385 : f32
    %85 = vector.broadcast %cst_74 : f32 to vector<8x8xf32>
    %86 = arith.mulf %84, %85 : vector<8x8xf32>
    %cst_75 = arith.constant -1.000000e+30 : f32
    %87 = vector.broadcast %cst_75 : f32 to vector<8x8xf32>
    %88 = arith.select %2, %86, %87 : vector<8x8xi1>, vector<8x8xf32>
    %cst_76 = arith.constant dense<0xFF800000> : vector<8xf32>
    %89 = vector.multi_reduction <maximumf>, %88, %cst_76 [1] : vector<8x8xf32> to vector<8xf32>
    %90 = vector.shape_cast %89 : vector<8xf32> to vector<8x1xf32>
    %91 = vector.broadcast %90 : vector<8x1xf32> to vector<8x8xf32>
    %92 = arith.subf %88, %91 : vector<8x8xf32>
    %93 = math.exp %92 : vector<8x8xf32>
    %cst_77 = arith.constant dense<0.000000e+00> : vector<8xf32>
    %94 = vector.multi_reduction <add>, %93, %cst_77 [1] : vector<8x8xf32> to vector<8xf32>
    %95 = vector.shape_cast %94 : vector<8xf32> to vector<8x1xf32>
    %96 = tpu.reciprocal %95 {approx = true} : vector<8x1xf32> -> vector<8x1xf32>
    %97 = vector.broadcast %96 : vector<8x1xf32> to vector<8x8xf32>
    %98 = arith.mulf %93, %97 : vector<8x8xf32>
    %cst_78 = arith.constant dense<0.000000e+00> : vector<8x8xf32>
    %99 = tpu.matmul %98, %83, %cst_78 {dimension_numbers = #tpu.dot_dimension_numbers<[1], [0], [0], [1], [0, 0, 1, 1], [], []>} : vector<8x8xf32>, vector<8x8xf32>, vector<8x8xf32> -> vector<8x8xf32>
    %c0_79 = arith.constant 0 : index
    %c3_80 = arith.constant 3 : index
    %c0_81 = arith.constant 0 : index
    %c0_82 = arith.constant 0 : index
    %100 = vector.load %arg4[%c0_79, %c3_80, %c0_81, %c0_82] : memref<1x4x8x8xf32, #tpu.memory_space<vmem>>, vector<1x1x8x8xf32>
    %101 = vector.shape_cast %100 : vector<1x1x8x8xf32> to vector<8x8xf32>
    %102 = vector.shape_cast %99 : vector<8x8xf32> to vector<1x1x8x8xf32>
    tpu.vector_store %arg4[%c0_79, %c3_80, %c0_81, %c0_82], %102 {strides = array<i32>} : memref<1x4x8x8xf32, #tpu.memory_space<vmem>>, vector<1x1x8x8xf32>,
    return
  }
  func.func @transform_0(%arg0: i32) -> (i32, i32, i32, i32) {
    %c0_i32 = arith.constant 0 : i32
    %c0_i32_0 = arith.constant 0 : i32
    %c0_i32_1 = arith.constant 0 : i32
    %c0_i32_2 = arith.constant 0 : i32
    return %arg0, %c0_i32, %c0_i32_0, %c0_i32_1 : i32, i32, i32, i32
  }
  func.func @transform_1(%arg0: i32) -> (i32, i32, i32, i32) {
    %c0_i32 = arith.constant 0 : i32
    %c0_i32_0 = arith.constant 0 : i32
    %c0_i32_1 = arith.constant 0 : i32
    %c0_i32_2 = arith.constant 0 : i32
    return %arg0, %c0_i32, %c0_i32_0, %c0_i32_1 : i32, i32, i32, i32
  }
  func.func @transform_2(%arg0: i32) -> (i32, i32, i32, i32) {
    %c0_i32 = arith.constant 0 : i32
    %c0_i32_0 = arith.constant 0 : i32
    %c0_i32_1 = arith.constant 0 : i32
    %c0_i32_2 = arith.constant 0 : i32
    return %arg0, %c0_i32, %c0_i32_0, %c0_i32_1 : i32, i32, i32, i32
  }
  func.func @transform_3(%arg0: i32) -> (i32, i32, i32, i32) {
    %c0_i32 = arith.constant 0 : i32
    %c0_i32_0 = arith.constant 0 : i32
    %c0_i32_1 = arith.constant 0 : i32
    %c0_i32_2 = arith.constant 0 : i32
    return %arg0, %c0_i32, %c0_i32_0, %c0_i32_1 : i32, i32, i32, i32
  }
}

module attributes {stable_mosaic.version = 11 : i64} {
  func.func @_linear_res_ln_kernel(%arg0: i32, %arg1: i32, %arg2: memref<16x32xf32, #tpu.memory_space<vmem>>, %arg3: memref<32x32xf32, #tpu.memory_space<vmem>>, %arg4: memref<1x32xf32, #tpu.memory_space<vmem>>, %arg5: memref<16x32xf32, #tpu.memory_space<vmem>>, %arg6: memref<1x32xf32, #tpu.memory_space<vmem>>, %arg7: memref<1x32xf32, #tpu.memory_space<vmem>>, %arg8: memref<16x32xf32, #tpu.memory_space<vmem>>, %arg9: memref<16x32xf32, #tpu.memory_space<vmem>>) attributes {dimension_semantics = [#tpu.dimension_semantics<parallel>, #tpu.dimension_semantics<arbitrary>], iteration_bounds = array<i64: 1, 1>, scalar_prefetch = 0 : i64, scratch_operands = 1 : i64, tpu.core_type = #tpu.core_type<tc>, window_params = [{transform_indices = @transform_0, window_bounds = array<i64: 16, 32>}, {transform_indices = @transform_1, window_bounds = array<i64: 32, 32>}, {pipeline_mode = #tpu.pipeline_mode<synchronous>, transform_indices = @transform_2, window_bounds = array<i64: 1, 32>}, {transform_indices = @transform_3, window_bounds = array<i64: 16, 32>}, {pipeline_mode = #tpu.pipeline_mode<synchronous>, transform_indices = @transform_4, window_bounds = array<i64: 1, 32>}, {pipeline_mode = #tpu.pipeline_mode<synchronous>, transform_indices = @transform_5, window_bounds = array<i64: 1, 32>}, {transform_indices = @transform_6, window_bounds = array<i64: 16, 32>}]} {
    %c0_i32 = arith.constant 0 : i32
    %0 = arith.cmpi eq, %arg1, %c0_i32 : i32
    %1 = arith.extui %0 : i1 to i32
    %c0_i32_0 = arith.constant 0 : i32
    %2 = arith.cmpi ne, %1, %c0_i32_0 : i32
    scf.if %2 {
      %cst_10 = arith.constant 0.000000e+00 : f32
      %12 = vector.broadcast %cst_10 : f32 to vector<16x32xf32>
      %c0_11 = arith.constant 0 : index
      %c0_12 = arith.constant 0 : index
      %13 = vector.load %arg9[%c0_11, %c0_12] : memref<16x32xf32, #tpu.memory_space<vmem>>, vector<16x32xf32>
      tpu.vector_store %arg9[%c0_11, %c0_12], %12 {strides = array<i32>} : memref<16x32xf32, #tpu.memory_space<vmem>>, vector<16x32xf32>,
    } else {
    }
    %c0 = arith.constant 0 : index
    %c0_1 = arith.constant 0 : index
    %3 = vector.load %arg9[%c0, %c0_1] : memref<16x32xf32, #tpu.memory_space<vmem>>, vector<16x32xf32>
    %c0_2 = arith.constant 0 : index
    %c0_3 = arith.constant 0 : index
    %4 = vector.load %arg2[%c0_2, %c0_3] : memref<16x32xf32, #tpu.memory_space<vmem>>, vector<16x32xf32>
    %c0_4 = arith.constant 0 : index
    %c0_5 = arith.constant 0 : index
    %5 = vector.load %arg3[%c0_4, %c0_5] : memref<32x32xf32, #tpu.memory_space<vmem>>, vector<32x32xf32>
    %cst = arith.constant dense<0.000000e+00> : vector<16x32xf32>
    %6 = tpu.matmul %4, %5, %cst {dimension_numbers = #tpu.dot_dimension_numbers<[1], [0], [0], [1], [0, 0, 1, 1], [], []>} : vector<16x32xf32>, vector<32x32xf32>, vector<16x32xf32> -> vector<16x32xf32>
    %7 = arith.addf %3, %6 : vector<16x32xf32>
    %c0_6 = arith.constant 0 : index
    %c0_7 = arith.constant 0 : index
    %8 = vector.load %arg9[%c0_6, %c0_7] : memref<16x32xf32, #tpu.memory_space<vmem>>, vector<16x32xf32>
    tpu.vector_store %arg9[%c0_6, %c0_7], %7 {strides = array<i32>} : memref<16x32xf32, #tpu.memory_space<vmem>>, vector<16x32xf32>,
    %c0_i32_8 = arith.constant 0 : i32
    %9 = arith.cmpi eq, %arg1, %c0_i32_8 : i32
    %10 = arith.extui %9 : i1 to i32
    %c0_i32_9 = arith.constant 0 : i32
    %11 = arith.cmpi ne, %10, %c0_i32_9 : i32
    scf.if %11 {
      %c0_10 = arith.constant 0 : index
      %c0_11 = arith.constant 0 : index
      %12 = vector.load %arg9[%c0_10, %c0_11] : memref<16x32xf32, #tpu.memory_space<vmem>>, vector<16x32xf32>
      %c0_12 = arith.constant 0 : index
      %c0_13 = arith.constant 0 : index
      %13 = vector.load %arg4[%c0_12, %c0_13] : memref<1x32xf32, #tpu.memory_space<vmem>>, vector<1x32xf32>
      %14 = vector.broadcast %13 : vector<1x32xf32> to vector<16x32xf32>
      %15 = arith.addf %12, %14 : vector<16x32xf32>
      %c0_14 = arith.constant 0 : index
      %c0_15 = arith.constant 0 : index
      %16 = vector.load %arg5[%c0_14, %c0_15] : memref<16x32xf32, #tpu.memory_space<vmem>>, vector<16x32xf32>
      %17 = arith.addf %15, %16 : vector<16x32xf32>
      %cst_16 = arith.constant dense<0.000000e+00> : vector<16xf32>
      %18 = vector.multi_reduction <add>, %17, %cst_16 [1] : vector<16x32xf32> to vector<16xf32>
      %19 = vector.shape_cast %18 : vector<16xf32> to vector<16x1xf32>
      %cst_17 = arith.constant 3.200000e+01 : f32
      %20 = vector.broadcast %cst_17 : f32 to vector<16x1xf32>
      %21 = arith.divf %19, %20 : vector<16x1xf32>
      %22 = vector.broadcast %21 : vector<16x1xf32> to vector<16x32xf32>
      %23 = arith.subf %17, %22 : vector<16x32xf32>
      %24 = arith.mulf %23, %23 : vector<16x32xf32>
      %cst_18 = arith.constant dense<0.000000e+00> : vector<16xf32>
      %25 = vector.multi_reduction <add>, %24, %cst_18 [1] : vector<16x32xf32> to vector<16xf32>
      %26 = vector.shape_cast %25 : vector<16xf32> to vector<16x1xf32>
      %cst_19 = arith.constant 3.200000e+01 : f32
      %27 = vector.broadcast %cst_19 : f32 to vector<16x1xf32>
      %28 = arith.divf %26, %27 : vector<16x1xf32>
      %29 = vector.broadcast %21 : vector<16x1xf32> to vector<16x32xf32>
      %30 = arith.subf %17, %29 : vector<16x32xf32>
      %cst_20 = arith.constant 9.99999974E-6 : f32
      %31 = vector.broadcast %cst_20 : f32 to vector<16x1xf32>
      %32 = arith.addf %28, %31 : vector<16x1xf32>
      %33 = math.rsqrt %32 : vector<16x1xf32>
      %34 = vector.broadcast %33 : vector<16x1xf32> to vector<16x32xf32>
      %35 = arith.mulf %30, %34 : vector<16x32xf32>
      %c0_21 = arith.constant 0 : index
      %c0_22 = arith.constant 0 : index
      %36 = vector.load %arg6[%c0_21, %c0_22] : memref<1x32xf32, #tpu.memory_space<vmem>>, vector<1x32xf32>
      %37 = vector.broadcast %36 : vector<1x32xf32> to vector<16x32xf32>
      %38 = arith.mulf %35, %37 : vector<16x32xf32>
      %c0_23 = arith.constant 0 : index
      %c0_24 = arith.constant 0 : index
      %39 = vector.load %arg7[%c0_23, %c0_24] : memref<1x32xf32, #tpu.memory_space<vmem>>, vector<1x32xf32>
      %40 = vector.broadcast %39 : vector<1x32xf32> to vector<16x32xf32>
      %41 = arith.addf %38, %40 : vector<16x32xf32>
      %c0_25 = arith.constant 0 : index
      %c0_26 = arith.constant 0 : index
      %42 = vector.load %arg8[%c0_25, %c0_26] : memref<16x32xf32, #tpu.memory_space<vmem>>, vector<16x32xf32>
      tpu.vector_store %arg8[%c0_25, %c0_26], %41 {strides = array<i32>} : memref<16x32xf32, #tpu.memory_space<vmem>>, vector<16x32xf32>,
    } else {
    }
    return
  }
  func.func @transform_0(%arg0: i32, %arg1: i32) -> (i32, i32) {
    %c0_i32 = arith.constant 0 : i32
    return %arg0, %arg1 : i32, i32
  }
  func.func @transform_1(%arg0: i32, %arg1: i32) -> (i32, i32) {
    %c0_i32 = arith.constant 0 : i32
    %c0_i32_0 = arith.constant 0 : i32
    return %arg1, %c0_i32 : i32, i32
  }
  func.func @transform_2(%arg0: i32, %arg1: i32) -> (i32, i32) {
    %c0_i32 = arith.constant 0 : i32
    %c0_i32_0 = arith.constant 0 : i32
    %c0_i32_1 = arith.constant 0 : i32
    return %c0_i32, %c0_i32_0 : i32, i32
  }
  func.func @transform_3(%arg0: i32, %arg1: i32) -> (i32, i32) {
    %c0_i32 = arith.constant 0 : i32
    %c0_i32_0 = arith.constant 0 : i32
    return %arg0, %c0_i32 : i32, i32
  }
  func.func @transform_4(%arg0: i32, %arg1: i32) -> (i32, i32) {
    %c0_i32 = arith.constant 0 : i32
    %c0_i32_0 = arith.constant 0 : i32
    %c0_i32_1 = arith.constant 0 : i32
    return %c0_i32, %c0_i32_0 : i32, i32
  }
  func.func @transform_5(%arg0: i32, %arg1: i32) -> (i32, i32) {
    %c0_i32 = arith.constant 0 : i32
    %c0_i32_0 = arith.constant 0 : i32
    %c0_i32_1 = arith.constant 0 : i32
    return %c0_i32, %c0_i32_0 : i32, i32
  }
  func.func @transform_6(%arg0: i32, %arg1: i32) -> (i32, i32) {
    %c0_i32 = arith.constant 0 : i32
    %c0_i32_0 = arith.constant 0 : i32
    return %arg0, %c0_i32 : i32, i32
  }
}

module attributes {stable_mosaic.version = 11 : i64} {
  func.func @_linear_kernel(%arg0: i32, %arg1: i32, %arg2: i32, %arg3: memref<16x32xf32, #tpu.memory_space<vmem>>, %arg4: memref<32x32xf32, #tpu.memory_space<vmem>>, %arg5: memref<1x32xf32, #tpu.memory_space<vmem>>, %arg6: memref<16x32xf32, #tpu.memory_space<vmem>>, %arg7: memref<16x32xf32, #tpu.memory_space<vmem>>) attributes {dimension_semantics = [#tpu.dimension_semantics<parallel>, #tpu.dimension_semantics<parallel>, #tpu.dimension_semantics<arbitrary>], iteration_bounds = array<i64: 1, 1, 1>, scalar_prefetch = 0 : i64, scratch_operands = 1 : i64, tpu.core_type = #tpu.core_type<tc>, window_params = [{transform_indices = @transform_0, window_bounds = array<i64: 16, 32>}, {transform_indices = @transform_1, window_bounds = array<i64: 32, 32>}, {transform_indices = @transform_2, window_bounds = array<i64: 1, 32>}, {transform_indices = @transform_3, window_bounds = array<i64: 16, 32>}]} {
    %c0_i32 = arith.constant 0 : i32
    %0 = arith.cmpi eq, %arg2, %c0_i32 : i32
    %1 = arith.extui %0 : i1 to i32
    %c0_i32_0 = arith.constant 0 : i32
    %2 = arith.cmpi ne, %1, %c0_i32_0 : i32
    scf.if %2 {
      %cst_10 = arith.constant 0.000000e+00 : f32
      %12 = vector.broadcast %cst_10 : f32 to vector<16x32xf32>
      %c0_11 = arith.constant 0 : index
      %c0_12 = arith.constant 0 : index
      %13 = vector.load %arg7[%c0_11, %c0_12] : memref<16x32xf32, #tpu.memory_space<vmem>>, vector<16x32xf32>
      tpu.vector_store %arg7[%c0_11, %c0_12], %12 {strides = array<i32>} : memref<16x32xf32, #tpu.memory_space<vmem>>, vector<16x32xf32>,
    } else {
    }
    %c0 = arith.constant 0 : index
    %c0_1 = arith.constant 0 : index
    %3 = vector.load %arg7[%c0, %c0_1] : memref<16x32xf32, #tpu.memory_space<vmem>>, vector<16x32xf32>
    %c0_2 = arith.constant 0 : index
    %c0_3 = arith.constant 0 : index
    %4 = vector.load %arg3[%c0_2, %c0_3] : memref<16x32xf32, #tpu.memory_space<vmem>>, vector<16x32xf32>
    %c0_4 = arith.constant 0 : index
    %c0_5 = arith.constant 0 : index
    %5 = vector.load %arg4[%c0_4, %c0_5] : memref<32x32xf32, #tpu.memory_space<vmem>>, vector<32x32xf32>
    %cst = arith.constant dense<0.000000e+00> : vector<16x32xf32>
    %6 = tpu.matmul %4, %5, %cst {dimension_numbers = #tpu.dot_dimension_numbers<[1], [0], [0], [1], [0, 0, 1, 1], [], []>} : vector<16x32xf32>, vector<32x32xf32>, vector<16x32xf32> -> vector<16x32xf32>
    %7 = arith.addf %3, %6 : vector<16x32xf32>
    %c0_6 = arith.constant 0 : index
    %c0_7 = arith.constant 0 : index
    %8 = vector.load %arg7[%c0_6, %c0_7] : memref<16x32xf32, #tpu.memory_space<vmem>>, vector<16x32xf32>
    tpu.vector_store %arg7[%c0_6, %c0_7], %7 {strides = array<i32>} : memref<16x32xf32, #tpu.memory_space<vmem>>, vector<16x32xf32>,
    %c0_i32_8 = arith.constant 0 : i32
    %9 = arith.cmpi eq, %arg2, %c0_i32_8 : i32
    %10 = arith.extui %9 : i1 to i32
    %c0_i32_9 = arith.constant 0 : i32
    %11 = arith.cmpi ne, %10, %c0_i32_9 : i32
    scf.if %11 {
      %c0_10 = arith.constant 0 : index
      %c0_11 = arith.constant 0 : index
      %12 = vector.load %arg7[%c0_10, %c0_11] : memref<16x32xf32, #tpu.memory_space<vmem>>, vector<16x32xf32>
      %c0_12 = arith.constant 0 : index
      %c0_13 = arith.constant 0 : index
      %13 = vector.load %arg5[%c0_12, %c0_13] : memref<1x32xf32, #tpu.memory_space<vmem>>, vector<1x32xf32>
      %14 = vector.broadcast %13 : vector<1x32xf32> to vector<16x32xf32>
      %15 = arith.addf %12, %14 : vector<16x32xf32>
      %c0_14 = arith.constant 0 : index
      %c0_15 = arith.constant 0 : index
      %16 = vector.load %arg6[%c0_14, %c0_15] : memref<16x32xf32, #tpu.memory_space<vmem>>, vector<16x32xf32>
      tpu.vector_store %arg6[%c0_14, %c0_15], %15 {strides = array<i32>} : memref<16x32xf32, #tpu.memory_space<vmem>>, vector<16x32xf32>,
    } else {
    }
    return
  }
  func.func @transform_0(%arg0: i32, %arg1: i32, %arg2: i32) -> (i32, i32) {
    %c0_i32 = arith.constant 0 : i32
    return %arg0, %arg2 : i32, i32
  }
  func.func @transform_1(%arg0: i32, %arg1: i32, %arg2: i32) -> (i32, i32) {
    %c0_i32 = arith.constant 0 : i32
    return %arg2, %arg1 : i32, i32
  }
  func.func @transform_2(%arg0: i32, %arg1: i32, %arg2: i32) -> (i32, i32) {
    %c0_i32 = arith.constant 0 : i32
    %c0_i32_0 = arith.constant 0 : i32
    return %c0_i32, %arg1 : i32, i32
  }
  func.func @transform_3(%arg0: i32, %arg1: i32, %arg2: i32) -> (i32, i32) {
    %c0_i32 = arith.constant 0 : i32
    return %arg0, %arg1 : i32, i32
  }
}

module attributes {stable_mosaic.version = 11 : i64} {
  func.func @_linear_kernel(%arg0: i32, %arg1: i32, %arg2: i32, %arg3: memref<16x32xf32, #tpu.memory_space<vmem>>, %arg4: memref<32x64xf32, #tpu.memory_space<vmem>>, %arg5: memref<1x64xf32, #tpu.memory_space<vmem>>, %arg6: memref<16x64xf32, #tpu.memory_space<vmem>>, %arg7: memref<16x64xf32, #tpu.memory_space<vmem>>) attributes {dimension_semantics = [#tpu.dimension_semantics<parallel>, #tpu.dimension_semantics<parallel>, #tpu.dimension_semantics<arbitrary>], iteration_bounds = array<i64: 1, 1, 1>, scalar_prefetch = 0 : i64, scratch_operands = 1 : i64, tpu.core_type = #tpu.core_type<tc>, window_params = [{transform_indices = @transform_0, window_bounds = array<i64: 16, 32>}, {transform_indices = @transform_1, window_bounds = array<i64: 32, 64>}, {transform_indices = @transform_2, window_bounds = array<i64: 1, 64>}, {transform_indices = @transform_3, window_bounds = array<i64: 16, 64>}]} {
    %c0_i32 = arith.constant 0 : i32
    %0 = arith.cmpi eq, %arg2, %c0_i32 : i32
    %1 = arith.extui %0 : i1 to i32
    %c0_i32_0 = arith.constant 0 : i32
    %2 = arith.cmpi ne, %1, %c0_i32_0 : i32
    scf.if %2 {
      %cst_10 = arith.constant 0.000000e+00 : f32
      %12 = vector.broadcast %cst_10 : f32 to vector<16x64xf32>
      %c0_11 = arith.constant 0 : index
      %c0_12 = arith.constant 0 : index
      %13 = vector.load %arg7[%c0_11, %c0_12] : memref<16x64xf32, #tpu.memory_space<vmem>>, vector<16x64xf32>
      tpu.vector_store %arg7[%c0_11, %c0_12], %12 {strides = array<i32>} : memref<16x64xf32, #tpu.memory_space<vmem>>, vector<16x64xf32>,
    } else {
    }
    %c0 = arith.constant 0 : index
    %c0_1 = arith.constant 0 : index
    %3 = vector.load %arg7[%c0, %c0_1] : memref<16x64xf32, #tpu.memory_space<vmem>>, vector<16x64xf32>
    %c0_2 = arith.constant 0 : index
    %c0_3 = arith.constant 0 : index
    %4 = vector.load %arg3[%c0_2, %c0_3] : memref<16x32xf32, #tpu.memory_space<vmem>>, vector<16x32xf32>
    %c0_4 = arith.constant 0 : index
    %c0_5 = arith.constant 0 : index
    %5 = vector.load %arg4[%c0_4, %c0_5] : memref<32x64xf32, #tpu.memory_space<vmem>>, vector<32x64xf32>
    %cst = arith.constant dense<0.000000e+00> : vector<16x64xf32>
    %6 = tpu.matmul %4, %5, %cst {dimension_numbers = #tpu.dot_dimension_numbers<[1], [0], [0], [1], [0, 0, 1, 1], [], []>} : vector<16x32xf32>, vector<32x64xf32>, vector<16x64xf32> -> vector<16x64xf32>
    %7 = arith.addf %3, %6 : vector<16x64xf32>
    %c0_6 = arith.constant 0 : index
    %c0_7 = arith.constant 0 : index
    %8 = vector.load %arg7[%c0_6, %c0_7] : memref<16x64xf32, #tpu.memory_space<vmem>>, vector<16x64xf32>
    tpu.vector_store %arg7[%c0_6, %c0_7], %7 {strides = array<i32>} : memref<16x64xf32, #tpu.memory_space<vmem>>, vector<16x64xf32>,
    %c0_i32_8 = arith.constant 0 : i32
    %9 = arith.cmpi eq, %arg2, %c0_i32_8 : i32
    %10 = arith.extui %9 : i1 to i32
    %c0_i32_9 = arith.constant 0 : i32
    %11 = arith.cmpi ne, %10, %c0_i32_9 : i32
    scf.if %11 {
      %c0_10 = arith.constant 0 : index
      %c0_11 = arith.constant 0 : index
      %12 = vector.load %arg7[%c0_10, %c0_11] : memref<16x64xf32, #tpu.memory_space<vmem>>, vector<16x64xf32>
      %c0_12 = arith.constant 0 : index
      %c0_13 = arith.constant 0 : index
      %13 = vector.load %arg5[%c0_12, %c0_13] : memref<1x64xf32, #tpu.memory_space<vmem>>, vector<1x64xf32>
      %14 = vector.broadcast %13 : vector<1x64xf32> to vector<16x64xf32>
      %15 = arith.addf %12, %14 : vector<16x64xf32>
      %c0_14 = arith.constant 0 : index
      %c0_15 = arith.constant 0 : index
      %16 = vector.load %arg6[%c0_14, %c0_15] : memref<16x64xf32, #tpu.memory_space<vmem>>, vector<16x64xf32>
      tpu.vector_store %arg6[%c0_14, %c0_15], %15 {strides = array<i32>} : memref<16x64xf32, #tpu.memory_space<vmem>>, vector<16x64xf32>,
    } else {
    }
    return
  }
  func.func @transform_0(%arg0: i32, %arg1: i32, %arg2: i32) -> (i32, i32) {
    %c0_i32 = arith.constant 0 : i32
    return %arg0, %arg2 : i32, i32
  }
  func.func @transform_1(%arg0: i32, %arg1: i32, %arg2: i32) -> (i32, i32) {
    %c0_i32 = arith.constant 0 : i32
    return %arg2, %arg1 : i32, i32
  }
  func.func @transform_2(%arg0: i32, %arg1: i32, %arg2: i32) -> (i32, i32) {
    %c0_i32 = arith.constant 0 : i32
    %c0_i32_0 = arith.constant 0 : i32
    return %c0_i32, %arg1 : i32, i32
  }
  func.func @transform_3(%arg0: i32, %arg1: i32, %arg2: i32) -> (i32, i32) {
    %c0_i32 = arith.constant 0 : i32
    return %arg0, %arg1 : i32, i32
  }
}

module attributes {stable_mosaic.version = 11 : i64} {
  func.func @_attn_kernel(%arg0: i32, %arg1: memref<1x4x8x8xf32, #tpu.memory_space<vmem>>, %arg2: memref<1x4x8x8xf32, #tpu.memory_space<vmem>>, %arg3: memref<1x4x8x8xf32, #tpu.memory_space<vmem>>, %arg4: memref<1x4x8x8xf32, #tpu.memory_space<vmem>>) attributes {dimension_semantics = [#tpu.dimension_semantics<parallel>], iteration_bounds = array<i64: 2>, scalar_prefetch = 0 : i64, scratch_operands = 0 : i64, tpu.core_type = #tpu.core_type<tc>, window_params = [{transform_indices = @transform_0, window_bounds = array<i64: 1, 4, 8, 8>}, {transform_indices = @transform_1, window_bounds = array<i64: 1, 4, 8, 8>}, {transform_indices = @transform_2, window_bounds = array<i64: 1, 4, 8, 8>}, {transform_indices = @transform_3, window_bounds = array<i64: 1, 4, 8, 8>}]} {
    %c0 = arith.constant 0 : index
    %c0_0 = arith.constant 0 : index
    %c0_1 = arith.constant 0 : index
    %c0_2 = arith.constant 0 : index
    %0 = vector.load %arg1[%c0, %c0_0, %c0_1, %c0_2] : memref<1x4x8x8xf32, #tpu.memory_space<vmem>>, vector<1x1x8x8xf32>
    %1 = vector.shape_cast %0 : vector<1x1x8x8xf32> to vector<8x8xf32>
    %c0_3 = arith.constant 0 : index
    %c0_4 = arith.constant 0 : index
    %c0_5 = arith.constant 0 : index
    %c0_6 = arith.constant 0 : index
    %2 = vector.load %arg2[%c0_3, %c0_4, %c0_5, %c0_6] : memref<1x4x8x8xf32, #tpu.memory_space<vmem>>, vector<1x1x8x8xf32>
    %3 = vector.shape_cast %2 : vector<1x1x8x8xf32> to vector<8x8xf32>
    %c0_7 = arith.constant 0 : index
    %c0_8 = arith.constant 0 : index
    %c0_9 = arith.constant 0 : index
    %c0_10 = arith.constant 0 : index
    %4 = vector.load %arg3[%c0_7, %c0_8, %c0_9, %c0_10] : memref<1x4x8x8xf32, #tpu.memory_space<vmem>>, vector<1x1x8x8xf32>
    %5 = vector.shape_cast %4 : vector<1x1x8x8xf32> to vector<8x8xf32>
    %cst = arith.constant dense<0.000000e+00> : vector<8x8xf32>
    %6 = tpu.matmul %1, %3, %cst {dimension_numbers = #tpu.dot_dimension_numbers<[1], [1], [0], [0], [0, 0, 1, 0], [], []>} : vector<8x8xf32>, vector<8x8xf32>, vector<8x8xf32> -> vector<8x8xf32>
    %cst_11 = arith.constant 0.353553385 : f32
    %7 = vector.broadcast %cst_11 : f32 to vector<8x8xf32>
    %8 = arith.mulf %6, %7 : vector<8x8xf32>
    %cst_12 = arith.constant dense<0xFF800000> : vector<8xf32>
    %9 = vector.multi_reduction <maximumf>, %8, %cst_12 [1] : vector<8x8xf32> to vector<8xf32>
    %10 = vector.shape_cast %9 : vector<8xf32> to vector<8x1xf32>
    %11 = vector.broadcast %10 : vector<8x1xf32> to vector<8x8xf32>
    %12 = arith.subf %8, %11 : vector<8x8xf32>
    %13 = math.exp %12 : vector<8x8xf32>
    %cst_13 = arith.constant dense<0.000000e+00> : vector<8xf32>
    %14 = vector.multi_reduction <add>, %13, %cst_13 [1] : vector<8x8xf32> to vector<8xf32>
    %15 = vector.shape_cast %14 : vector<8xf32> to vector<8x1xf32>
    %16 = tpu.reciprocal %15 {approx = true} : vector<8x1xf32> -> vector<8x1xf32>
    %17 = vector.broadcast %16 : vector<8x1xf32> to vector<8x8xf32>
    %18 = arith.mulf %13, %17 : vector<8x8xf32>
    %cst_14 = arith.constant dense<0.000000e+00> : vector<8x8xf32>
    %19 = tpu.matmul %18, %5, %cst_14 {dimension_numbers = #tpu.dot_dimension_numbers<[1], [0], [0], [1], [0, 0, 1, 1], [], []>} : vector<8x8xf32>, vector<8x8xf32>, vector<8x8xf32> -> vector<8x8xf32>
    %c0_15 = arith.constant 0 : index
    %c0_16 = arith.constant 0 : index
    %c0_17 = arith.constant 0 : index
    %c0_18 = arith.constant 0 : index
    %20 = vector.load %arg4[%c0_15, %c0_16, %c0_17, %c0_18] : memref<1x4x8x8xf32, #tpu.memory_space<vmem>>, vector<1x1x8x8xf32>
    %21 = vector.shape_cast %20 : vector<1x1x8x8xf32> to vector<8x8xf32>
    %22 = vector.shape_cast %19 : vector<8x8xf32> to vector<1x1x8x8xf32>
    tpu.vector_store %arg4[%c0_15, %c0_16, %c0_17, %c0_18], %22 {strides = array<i32>} : memref<1x4x8x8xf32, #tpu.memory_space<vmem>>, vector<1x1x8x8xf32>,
    %c0_19 = arith.constant 0 : index
    %c1 = arith.constant 1 : index
    %c0_20 = arith.constant 0 : index
    %c0_21 = arith.constant 0 : index
    %23 = vector.load %arg1[%c0_19, %c1, %c0_20, %c0_21] : memref<1x4x8x8xf32, #tpu.memory_space<vmem>>, vector<1x1x8x8xf32>
    %24 = vector.shape_cast %23 : vector<1x1x8x8xf32> to vector<8x8xf32>
    %c0_22 = arith.constant 0 : index
    %c1_23 = arith.constant 1 : index
    %c0_24 = arith.constant 0 : index
    %c0_25 = arith.constant 0 : index
    %25 = vector.load %arg2[%c0_22, %c1_23, %c0_24, %c0_25] : memref<1x4x8x8xf32, #tpu.memory_space<vmem>>, vector<1x1x8x8xf32>
    %26 = vector.shape_cast %25 : vector<1x1x8x8xf32> to vector<8x8xf32>
    %c0_26 = arith.constant 0 : index
    %c1_27 = arith.constant 1 : index
    %c0_28 = arith.constant 0 : index
    %c0_29 = arith.constant 0 : index
    %27 = vector.load %arg3[%c0_26, %c1_27, %c0_28, %c0_29] : memref<1x4x8x8xf32, #tpu.memory_space<vmem>>, vector<1x1x8x8xf32>
    %28 = vector.shape_cast %27 : vector<1x1x8x8xf32> to vector<8x8xf32>
    %cst_30 = arith.constant dense<0.000000e+00> : vector<8x8xf32>
    %29 = tpu.matmul %24, %26, %cst_30 {dimension_numbers = #tpu.dot_dimension_numbers<[1], [1], [0], [0], [0, 0, 1, 0], [], []>} : vector<8x8xf32>, vector<8x8xf32>, vector<8x8xf32> -> vector<8x8xf32>
    %cst_31 = arith.constant 0.353553385 : f32
    %30 = vector.broadcast %cst_31 : f32 to vector<8x8xf32>
    %31 = arith.mulf %29, %30 : vector<8x8xf32>
    %cst_32 = arith.constant dense<0xFF800000> : vector<8xf32>
    %32 = vector.multi_reduction <maximumf>, %31, %cst_32 [1] : vector<8x8xf32> to vector<8xf32>
    %33 = vector.shape_cast %32 : vector<8xf32> to vector<8x1xf32>
    %34 = vector.broadcast %33 : vector<8x1xf32> to vector<8x8xf32>
    %35 = arith.subf %31, %34 : vector<8x8xf32>
    %36 = math.exp %35 : vector<8x8xf32>
    %cst_33 = arith.constant dense<0.000000e+00> : vector<8xf32>
    %37 = vector.multi_reduction <add>, %36, %cst_33 [1] : vector<8x8xf32> to vector<8xf32>
    %38 = vector.shape_cast %37 : vector<8xf32> to vector<8x1xf32>
    %39 = tpu.reciprocal %38 {approx = true} : vector<8x1xf32> -> vector<8x1xf32>
    %40 = vector.broadcast %39 : vector<8x1xf32> to vector<8x8xf32>
    %41 = arith.mulf %36, %40 : vector<8x8xf32>
    %cst_34 = arith.constant dense<0.000000e+00> : vector<8x8xf32>
    %42 = tpu.matmul %41, %28, %cst_34 {dimension_numbers = #tpu.dot_dimension_numbers<[1], [0], [0], [1], [0, 0, 1, 1], [], []>} : vector<8x8xf32>, vector<8x8xf32>, vector<8x8xf32> -> vector<8x8xf32>
    %c0_35 = arith.constant 0 : index
    %c1_36 = arith.constant 1 : index
    %c0_37 = arith.constant 0 : index
    %c0_38 = arith.constant 0 : index
    %43 = vector.load %arg4[%c0_35, %c1_36, %c0_37, %c0_38] : memref<1x4x8x8xf32, #tpu.memory_space<vmem>>, vector<1x1x8x8xf32>
    %44 = vector.shape_cast %43 : vector<1x1x8x8xf32> to vector<8x8xf32>
    %45 = vector.shape_cast %42 : vector<8x8xf32> to vector<1x1x8x8xf32>
    tpu.vector_store %arg4[%c0_35, %c1_36, %c0_37, %c0_38], %45 {strides = array<i32>} : memref<1x4x8x8xf32, #tpu.memory_space<vmem>>, vector<1x1x8x8xf32>,
    %c0_39 = arith.constant 0 : index
    %c2 = arith.constant 2 : index
    %c0_40 = arith.constant 0 : index
    %c0_41 = arith.constant 0 : index
    %46 = vector.load %arg1[%c0_39, %c2, %c0_40, %c0_41] : memref<1x4x8x8xf32, #tpu.memory_space<vmem>>, vector<1x1x8x8xf32>
    %47 = vector.shape_cast %46 : vector<1x1x8x8xf32> to vector<8x8xf32>
    %c0_42 = arith.constant 0 : index
    %c2_43 = arith.constant 2 : index
    %c0_44 = arith.constant 0 : index
    %c0_45 = arith.constant 0 : index
    %48 = vector.load %arg2[%c0_42, %c2_43, %c0_44, %c0_45] : memref<1x4x8x8xf32, #tpu.memory_space<vmem>>, vector<1x1x8x8xf32>
    %49 = vector.shape_cast %48 : vector<1x1x8x8xf32> to vector<8x8xf32>
    %c0_46 = arith.constant 0 : index
    %c2_47 = arith.constant 2 : index
    %c0_48 = arith.constant 0 : index
    %c0_49 = arith.constant 0 : index
    %50 = vector.load %arg3[%c0_46, %c2_47, %c0_48, %c0_49] : memref<1x4x8x8xf32, #tpu.memory_space<vmem>>, vector<1x1x8x8xf32>
    %51 = vector.shape_cast %50 : vector<1x1x8x8xf32> to vector<8x8xf32>
    %cst_50 = arith.constant dense<0.000000e+00> : vector<8x8xf32>
    %52 = tpu.matmul %47, %49, %cst_50 {dimension_numbers = #tpu.dot_dimension_numbers<[1], [1], [0], [0], [0, 0, 1, 0], [], []>} : vector<8x8xf32>, vector<8x8xf32>, vector<8x8xf32> -> vector<8x8xf32>
    %cst_51 = arith.constant 0.353553385 : f32
    %53 = vector.broadcast %cst_51 : f32 to vector<8x8xf32>
    %54 = arith.mulf %52, %53 : vector<8x8xf32>
    %cst_52 = arith.constant dense<0xFF800000> : vector<8xf32>
    %55 = vector.multi_reduction <maximumf>, %54, %cst_52 [1] : vector<8x8xf32> to vector<8xf32>
    %56 = vector.shape_cast %55 : vector<8xf32> to vector<8x1xf32>
    %57 = vector.broadcast %56 : vector<8x1xf32> to vector<8x8xf32>
    %58 = arith.subf %54, %57 : vector<8x8xf32>
    %59 = math.exp %58 : vector<8x8xf32>
    %cst_53 = arith.constant dense<0.000000e+00> : vector<8xf32>
    %60 = vector.multi_reduction <add>, %59, %cst_53 [1] : vector<8x8xf32> to vector<8xf32>
    %61 = vector.shape_cast %60 : vector<8xf32> to vector<8x1xf32>
    %62 = tpu.reciprocal %61 {approx = true} : vector<8x1xf32> -> vector<8x1xf32>
    %63 = vector.broadcast %62 : vector<8x1xf32> to vector<8x8xf32>
    %64 = arith.mulf %59, %63 : vector<8x8xf32>
    %cst_54 = arith.constant dense<0.000000e+00> : vector<8x8xf32>
    %65 = tpu.matmul %64, %51, %cst_54 {dimension_numbers = #tpu.dot_dimension_numbers<[1], [0], [0], [1], [0, 0, 1, 1], [], []>} : vector<8x8xf32>, vector<8x8xf32>, vector<8x8xf32> -> vector<8x8xf32>
    %c0_55 = arith.constant 0 : index
    %c2_56 = arith.constant 2 : index
    %c0_57 = arith.constant 0 : index
    %c0_58 = arith.constant 0 : index
    %66 = vector.load %arg4[%c0_55, %c2_56, %c0_57, %c0_58] : memref<1x4x8x8xf32, #tpu.memory_space<vmem>>, vector<1x1x8x8xf32>
    %67 = vector.shape_cast %66 : vector<1x1x8x8xf32> to vector<8x8xf32>
    %68 = vector.shape_cast %65 : vector<8x8xf32> to vector<1x1x8x8xf32>
    tpu.vector_store %arg4[%c0_55, %c2_56, %c0_57, %c0_58], %68 {strides = array<i32>} : memref<1x4x8x8xf32, #tpu.memory_space<vmem>>, vector<1x1x8x8xf32>,
    %c0_59 = arith.constant 0 : index
    %c3 = arith.constant 3 : index
    %c0_60 = arith.constant 0 : index
    %c0_61 = arith.constant 0 : index
    %69 = vector.load %arg1[%c0_59, %c3, %c0_60, %c0_61] : memref<1x4x8x8xf32, #tpu.memory_space<vmem>>, vector<1x1x8x8xf32>
    %70 = vector.shape_cast %69 : vector<1x1x8x8xf32> to vector<8x8xf32>
    %c0_62 = arith.constant 0 : index
    %c3_63 = arith.constant 3 : index
    %c0_64 = arith.constant 0 : index
    %c0_65 = arith.constant 0 : index
    %71 = vector.load %arg2[%c0_62, %c3_63, %c0_64, %c0_65] : memref<1x4x8x8xf32, #tpu.memory_space<vmem>>, vector<1x1x8x8xf32>
    %72 = vector.shape_cast %71 : vector<1x1x8x8xf32> to vector<8x8xf32>
    %c0_66 = arith.constant 0 : index
    %c3_67 = arith.constant 3 : index
    %c0_68 = arith.constant 0 : index
    %c0_69 = arith.constant 0 : index
    %73 = vector.load %arg3[%c0_66, %c3_67, %c0_68, %c0_69] : memref<1x4x8x8xf32, #tpu.memory_space<vmem>>, vector<1x1x8x8xf32>
    %74 = vector.shape_cast %73 : vector<1x1x8x8xf32> to vector<8x8xf32>
    %cst_70 = arith.constant dense<0.000000e+00> : vector<8x8xf32>
    %75 = tpu.matmul %70, %72, %cst_70 {dimension_numbers = #tpu.dot_dimension_numbers<[1], [1], [0], [0], [0, 0, 1, 0], [], []>} : vector<8x8xf32>, vector<8x8xf32>, vector<8x8xf32> -> vector<8x8xf32>
    %cst_71 = arith.constant 0.353553385 : f32
    %76 = vector.broadcast %cst_71 : f32 to vector<8x8xf32>
    %77 = arith.mulf %75, %76 : vector<8x8xf32>
    %cst_72 = arith.constant dense<0xFF800000> : vector<8xf32>
    %78 = vector.multi_reduction <maximumf>, %77, %cst_72 [1] : vector<8x8xf32> to vector<8xf32>
    %79 = vector.shape_cast %78 : vector<8xf32> to vector<8x1xf32>
    %80 = vector.broadcast %79 : vector<8x1xf32> to vector<8x8xf32>
    %81 = arith.subf %77, %80 : vector<8x8xf32>
    %82 = math.exp %81 : vector<8x8xf32>
    %cst_73 = arith.constant dense<0.000000e+00> : vector<8xf32>
    %83 = vector.multi_reduction <add>, %82, %cst_73 [1] : vector<8x8xf32> to vector<8xf32>
    %84 = vector.shape_cast %83 : vector<8xf32> to vector<8x1xf32>
    %85 = tpu.reciprocal %84 {approx = true} : vector<8x1xf32> -> vector<8x1xf32>
    %86 = vector.broadcast %85 : vector<8x1xf32> to vector<8x8xf32>
    %87 = arith.mulf %82, %86 : vector<8x8xf32>
    %cst_74 = arith.constant dense<0.000000e+00> : vector<8x8xf32>
    %88 = tpu.matmul %87, %74, %cst_74 {dimension_numbers = #tpu.dot_dimension_numbers<[1], [0], [0], [1], [0, 0, 1, 1], [], []>} : vector<8x8xf32>, vector<8x8xf32>, vector<8x8xf32> -> vector<8x8xf32>
    %c0_75 = arith.constant 0 : index
    %c3_76 = arith.constant 3 : index
    %c0_77 = arith.constant 0 : index
    %c0_78 = arith.constant 0 : index
    %89 = vector.load %arg4[%c0_75, %c3_76, %c0_77, %c0_78] : memref<1x4x8x8xf32, #tpu.memory_space<vmem>>, vector<1x1x8x8xf32>
    %90 = vector.shape_cast %89 : vector<1x1x8x8xf32> to vector<8x8xf32>
    %91 = vector.shape_cast %88 : vector<8x8xf32> to vector<1x1x8x8xf32>
    tpu.vector_store %arg4[%c0_75, %c3_76, %c0_77, %c0_78], %91 {strides = array<i32>} : memref<1x4x8x8xf32, #tpu.memory_space<vmem>>, vector<1x1x8x8xf32>,
    return
  }
  func.func @transform_0(%arg0: i32) -> (i32, i32, i32, i32) {
    %c0_i32 = arith.constant 0 : i32
    %c0_i32_0 = arith.constant 0 : i32
    %c0_i32_1 = arith.constant 0 : i32
    %c0_i32_2 = arith.constant 0 : i32
    return %arg0, %c0_i32, %c0_i32_0, %c0_i32_1 : i32, i32, i32, i32
  }
  func.func @transform_1(%arg0: i32) -> (i32, i32, i32, i32) {
    %c0_i32 = arith.constant 0 : i32
    %c0_i32_0 = arith.constant 0 : i32
    %c0_i32_1 = arith.constant 0 : i32
    %c0_i32_2 = arith.constant 0 : i32
    return %arg0, %c0_i32, %c0_i32_0, %c0_i32_1 : i32, i32, i32, i32
  }
  func.func @transform_2(%arg0: i32) -> (i32, i32, i32, i32) {
    %c0_i32 = arith.constant 0 : i32
    %c0_i32_0 = arith.constant 0 : i32
    %c0_i32_1 = arith.constant 0 : i32
    %c0_i32_2 = arith.constant 0 : i32
    return %arg0, %c0_i32, %c0_i32_0, %c0_i32_1 : i32, i32, i32, i32
  }
  func.func @transform_3(%arg0: i32) -> (i32, i32, i32, i32) {
    %c0_i32 = arith.constant 0 : i32
    %c0_i32_0 = arith.constant 0 : i32
    %c0_i32_1 = arith.constant 0 : i32
    %c0_i32_2 = arith.constant 0 : i32
    return %arg0, %c0_i32, %c0_i32_0, %c0_i32_1 : i32, i32, i32, i32
  }
}

module attributes {stable_mosaic.version = 11 : i64} {
  func.func @_linear_res_ln_kernel(%arg0: i32, %arg1: i32, %arg2: memref<16x64xf32, #tpu.memory_space<vmem>>, %arg3: memref<64x32xf32, #tpu.memory_space<vmem>>, %arg4: memref<1x32xf32, #tpu.memory_space<vmem>>, %arg5: memref<16x32xf32, #tpu.memory_space<vmem>>, %arg6: memref<1x32xf32, #tpu.memory_space<vmem>>, %arg7: memref<1x32xf32, #tpu.memory_space<vmem>>, %arg8: memref<16x32xf32, #tpu.memory_space<vmem>>, %arg9: memref<16x32xf32, #tpu.memory_space<vmem>>) attributes {dimension_semantics = [#tpu.dimension_semantics<parallel>, #tpu.dimension_semantics<arbitrary>], iteration_bounds = array<i64: 1, 1>, scalar_prefetch = 0 : i64, scratch_operands = 1 : i64, tpu.core_type = #tpu.core_type<tc>, window_params = [{transform_indices = @transform_0, window_bounds = array<i64: 16, 64>}, {transform_indices = @transform_1, window_bounds = array<i64: 64, 32>}, {pipeline_mode = #tpu.pipeline_mode<synchronous>, transform_indices = @transform_2, window_bounds = array<i64: 1, 32>}, {transform_indices = @transform_3, window_bounds = array<i64: 16, 32>}, {pipeline_mode = #tpu.pipeline_mode<synchronous>, transform_indices = @transform_4, window_bounds = array<i64: 1, 32>}, {pipeline_mode = #tpu.pipeline_mode<synchronous>, transform_indices = @transform_5, window_bounds = array<i64: 1, 32>}, {transform_indices = @transform_6, window_bounds = array<i64: 16, 32>}]} {
    %c0_i32 = arith.constant 0 : i32
    %0 = arith.cmpi eq, %arg1, %c0_i32 : i32
    %1 = arith.extui %0 : i1 to i32
    %c0_i32_0 = arith.constant 0 : i32
    %2 = arith.cmpi ne, %1, %c0_i32_0 : i32
    scf.if %2 {
      %cst_10 = arith.constant 0.000000e+00 : f32
      %12 = vector.broadcast %cst_10 : f32 to vector<16x32xf32>
      %c0_11 = arith.constant 0 : index
      %c0_12 = arith.constant 0 : index
      %13 = vector.load %arg9[%c0_11, %c0_12] : memref<16x32xf32, #tpu.memory_space<vmem>>, vector<16x32xf32>
      tpu.vector_store %arg9[%c0_11, %c0_12], %12 {strides = array<i32>} : memref<16x32xf32, #tpu.memory_space<vmem>>, vector<16x32xf32>,
    } else {
    }
    %c0 = arith.constant 0 : index
    %c0_1 = arith.constant 0 : index
    %3 = vector.load %arg9[%c0, %c0_1] : memref<16x32xf32, #tpu.memory_space<vmem>>, vector<16x32xf32>
    %c0_2 = arith.constant 0 : index
    %c0_3 = arith.constant 0 : index
    %4 = vector.load %arg2[%c0_2, %c0_3] : memref<16x64xf32, #tpu.memory_space<vmem>>, vector<16x64xf32>
    %c0_4 = arith.constant 0 : index
    %c0_5 = arith.constant 0 : index
    %5 = vector.load %arg3[%c0_4, %c0_5] : memref<64x32xf32, #tpu.memory_space<vmem>>, vector<64x32xf32>
    %cst = arith.constant dense<0.000000e+00> : vector<16x32xf32>
    %6 = tpu.matmul %4, %5, %cst {dimension_numbers = #tpu.dot_dimension_numbers<[1], [0], [0], [1], [0, 0, 1, 1], [], []>} : vector<16x64xf32>, vector<64x32xf32>, vector<16x32xf32> -> vector<16x32xf32>
    %7 = arith.addf %3, %6 : vector<16x32xf32>
    %c0_6 = arith.constant 0 : index
    %c0_7 = arith.constant 0 : index
    %8 = vector.load %arg9[%c0_6, %c0_7] : memref<16x32xf32, #tpu.memory_space<vmem>>, vector<16x32xf32>
    tpu.vector_store %arg9[%c0_6, %c0_7], %7 {strides = array<i32>} : memref<16x32xf32, #tpu.memory_space<vmem>>, vector<16x32xf32>,
    %c0_i32_8 = arith.constant 0 : i32
    %9 = arith.cmpi eq, %arg1, %c0_i32_8 : i32
    %10 = arith.extui %9 : i1 to i32
    %c0_i32_9 = arith.constant 0 : i32
    %11 = arith.cmpi ne, %10, %c0_i32_9 : i32
    scf.if %11 {
      %c0_10 = arith.constant 0 : index
      %c0_11 = arith.constant 0 : index
      %12 = vector.load %arg9[%c0_10, %c0_11] : memref<16x32xf32, #tpu.memory_space<vmem>>, vector<16x32xf32>
      %c0_12 = arith.constant 0 : index
      %c0_13 = arith.constant 0 : index
      %13 = vector.load %arg4[%c0_12, %c0_13] : memref<1x32xf32, #tpu.memory_space<vmem>>, vector<1x32xf32>
      %14 = vector.broadcast %13 : vector<1x32xf32> to vector<16x32xf32>
      %15 = arith.addf %12, %14 : vector<16x32xf32>
      %c0_14 = arith.constant 0 : index
      %c0_15 = arith.constant 0 : index
      %16 = vector.load %arg5[%c0_14, %c0_15] : memref<16x32xf32, #tpu.memory_space<vmem>>, vector<16x32xf32>
      %17 = arith.addf %15, %16 : vector<16x32xf32>
      %cst_16 = arith.constant dense<0.000000e+00> : vector<16xf32>
      %18 = vector.multi_reduction <add>, %17, %cst_16 [1] : vector<16x32xf32> to vector<16xf32>
      %19 = vector.shape_cast %18 : vector<16xf32> to vector<16x1xf32>
      %cst_17 = arith.constant 3.200000e+01 : f32
      %20 = vector.broadcast %cst_17 : f32 to vector<16x1xf32>
      %21 = arith.divf %19, %20 : vector<16x1xf32>
      %22 = vector.broadcast %21 : vector<16x1xf32> to vector<16x32xf32>
      %23 = arith.subf %17, %22 : vector<16x32xf32>
      %24 = arith.mulf %23, %23 : vector<16x32xf32>
      %cst_18 = arith.constant dense<0.000000e+00> : vector<16xf32>
      %25 = vector.multi_reduction <add>, %24, %cst_18 [1] : vector<16x32xf32> to vector<16xf32>
      %26 = vector.shape_cast %25 : vector<16xf32> to vector<16x1xf32>
      %cst_19 = arith.constant 3.200000e+01 : f32
      %27 = vector.broadcast %cst_19 : f32 to vector<16x1xf32>
      %28 = arith.divf %26, %27 : vector<16x1xf32>
      %29 = vector.broadcast %21 : vector<16x1xf32> to vector<16x32xf32>
      %30 = arith.subf %17, %29 : vector<16x32xf32>
      %cst_20 = arith.constant 9.99999974E-6 : f32
      %31 = vector.broadcast %cst_20 : f32 to vector<16x1xf32>
      %32 = arith.addf %28, %31 : vector<16x1xf32>
      %33 = math.rsqrt %32 : vector<16x1xf32>
      %34 = vector.broadcast %33 : vector<16x1xf32> to vector<16x32xf32>
      %35 = arith.mulf %30, %34 : vector<16x32xf32>
      %c0_21 = arith.constant 0 : index
      %c0_22 = arith.constant 0 : index
      %36 = vector.load %arg6[%c0_21, %c0_22] : memref<1x32xf32, #tpu.memory_space<vmem>>, vector<1x32xf32>
      %37 = vector.broadcast %36 : vector<1x32xf32> to vector<16x32xf32>
      %38 = arith.mulf %35, %37 : vector<16x32xf32>
      %c0_23 = arith.constant 0 : index
      %c0_24 = arith.constant 0 : index
      %39 = vector.load %arg7[%c0_23, %c0_24] : memref<1x32xf32, #tpu.memory_space<vmem>>, vector<1x32xf32>
      %40 = vector.broadcast %39 : vector<1x32xf32> to vector<16x32xf32>
      %41 = arith.addf %38, %40 : vector<16x32xf32>
      %c0_25 = arith.constant 0 : index
      %c0_26 = arith.constant 0 : index
      %42 = vector.load %arg8[%c0_25, %c0_26] : memref<16x32xf32, #tpu.memory_space<vmem>>, vector<16x32xf32>
      tpu.vector_store %arg8[%c0_25, %c0_26], %41 {strides = array<i32>} : memref<16x32xf32, #tpu.memory_space<vmem>>, vector<16x32xf32>,
    } else {
    }
    return
  }
  func.func @transform_0(%arg0: i32, %arg1: i32) -> (i32, i32) {
    %c0_i32 = arith.constant 0 : i32
    return %arg0, %arg1 : i32, i32
  }
  func.func @transform_1(%arg0: i32, %arg1: i32) -> (i32, i32) {
    %c0_i32 = arith.constant 0 : i32
    %c0_i32_0 = arith.constant 0 : i32
    return %arg1, %c0_i32 : i32, i32
  }
  func.func @transform_2(%arg0: i32, %arg1: i32) -> (i32, i32) {
    %c0_i32 = arith.constant 0 : i32
    %c0_i32_0 = arith.constant 0 : i32
    %c0_i32_1 = arith.constant 0 : i32
    return %c0_i32, %c0_i32_0 : i32, i32
  }
  func.func @transform_3(%arg0: i32, %arg1: i32) -> (i32, i32) {
    %c0_i32 = arith.constant 0 : i32
    %c0_i32_0 = arith.constant 0 : i32
    return %arg0, %c0_i32 : i32, i32
  }
  func.func @transform_4(%arg0: i32, %arg1: i32) -> (i32, i32) {
    %c0_i32 = arith.constant 0 : i32
    %c0_i32_0 = arith.constant 0 : i32
    %c0_i32_1 = arith.constant 0 : i32
    return %c0_i32, %c0_i32_0 : i32, i32
  }
  func.func @transform_5(%arg0: i32, %arg1: i32) -> (i32, i32) {
    %c0_i32 = arith.constant 0 : i32
    %c0_i32_0 = arith.constant 0 : i32
    %c0_i32_1 = arith.constant 0 : i32
    return %c0_i32, %c0_i32_0 : i32, i32
  }
  func.func @transform_6(%arg0: i32, %arg1: i32) -> (i32, i32) {
    %c0_i32 = arith.constant 0 : i32
    %c0_i32_0 = arith.constant 0 : i32
    return %arg0, %c0_i32 : i32, i32
  }
}

module attributes {stable_mosaic.version = 11 : i64} {
  func.func @_linear_kernel(%arg0: i32, %arg1: i32, %arg2: i32, %arg3: memref<16x32xf32, #tpu.memory_space<vmem>>, %arg4: memref<32x128xf32, #tpu.memory_space<vmem>>, %arg5: memref<1x128xf32, #tpu.memory_space<vmem>>, %arg6: memref<16x128xf32, #tpu.memory_space<vmem>>, %arg7: memref<16x128xf32, #tpu.memory_space<vmem>>) attributes {dimension_semantics = [#tpu.dimension_semantics<parallel>, #tpu.dimension_semantics<parallel>, #tpu.dimension_semantics<arbitrary>], iteration_bounds = array<i64: 1, 1, 1>, scalar_prefetch = 0 : i64, scratch_operands = 1 : i64, tpu.core_type = #tpu.core_type<tc>, window_params = [{transform_indices = @transform_0, window_bounds = array<i64: 16, 32>}, {transform_indices = @transform_1, window_bounds = array<i64: 32, 128>}, {transform_indices = @transform_2, window_bounds = array<i64: 1, 128>}, {transform_indices = @transform_3, window_bounds = array<i64: 16, 128>}]} {
    %c0_i32 = arith.constant 0 : i32
    %0 = arith.cmpi eq, %arg2, %c0_i32 : i32
    %1 = arith.extui %0 : i1 to i32
    %c0_i32_0 = arith.constant 0 : i32
    %2 = arith.cmpi ne, %1, %c0_i32_0 : i32
    scf.if %2 {
      %cst_10 = arith.constant 0.000000e+00 : f32
      %12 = vector.broadcast %cst_10 : f32 to vector<16x128xf32>
      %c0_11 = arith.constant 0 : index
      %c0_12 = arith.constant 0 : index
      %13 = vector.load %arg7[%c0_11, %c0_12] : memref<16x128xf32, #tpu.memory_space<vmem>>, vector<16x128xf32>
      tpu.vector_store %arg7[%c0_11, %c0_12], %12 {strides = array<i32>} : memref<16x128xf32, #tpu.memory_space<vmem>>, vector<16x128xf32>,
    } else {
    }
    %c0 = arith.constant 0 : index
    %c0_1 = arith.constant 0 : index
    %3 = vector.load %arg7[%c0, %c0_1] : memref<16x128xf32, #tpu.memory_space<vmem>>, vector<16x128xf32>
    %c0_2 = arith.constant 0 : index
    %c0_3 = arith.constant 0 : index
    %4 = vector.load %arg3[%c0_2, %c0_3] : memref<16x32xf32, #tpu.memory_space<vmem>>, vector<16x32xf32>
    %c0_4 = arith.constant 0 : index
    %c0_5 = arith.constant 0 : index
    %5 = vector.load %arg4[%c0_4, %c0_5] : memref<32x128xf32, #tpu.memory_space<vmem>>, vector<32x128xf32>
    %cst = arith.constant dense<0.000000e+00> : vector<16x128xf32>
    %6 = tpu.matmul %4, %5, %cst {dimension_numbers = #tpu.dot_dimension_numbers<[1], [0], [0], [1], [0, 0, 1, 1], [], []>} : vector<16x32xf32>, vector<32x128xf32>, vector<16x128xf32> -> vector<16x128xf32>
    %7 = arith.addf %3, %6 : vector<16x128xf32>
    %c0_6 = arith.constant 0 : index
    %c0_7 = arith.constant 0 : index
    %8 = vector.load %arg7[%c0_6, %c0_7] : memref<16x128xf32, #tpu.memory_space<vmem>>, vector<16x128xf32>
    tpu.vector_store %arg7[%c0_6, %c0_7], %7 {strides = array<i32>} : memref<16x128xf32, #tpu.memory_space<vmem>>, vector<16x128xf32>,
    %c0_i32_8 = arith.constant 0 : i32
    %9 = arith.cmpi eq, %arg2, %c0_i32_8 : i32
    %10 = arith.extui %9 : i1 to i32
    %c0_i32_9 = arith.constant 0 : i32
    %11 = arith.cmpi ne, %10, %c0_i32_9 : i32
    scf.if %11 {
      %c0_10 = arith.constant 0 : index
      %c0_11 = arith.constant 0 : index
      %12 = vector.load %arg7[%c0_10, %c0_11] : memref<16x128xf32, #tpu.memory_space<vmem>>, vector<16x128xf32>
      %c0_12 = arith.constant 0 : index
      %c0_13 = arith.constant 0 : index
      %13 = vector.load %arg5[%c0_12, %c0_13] : memref<1x128xf32, #tpu.memory_space<vmem>>, vector<1x128xf32>
      %14 = vector.broadcast %13 : vector<1x128xf32> to vector<16x128xf32>
      %15 = arith.addf %12, %14 : vector<16x128xf32>
      %c0_14 = arith.constant 0 : index
      %c0_15 = arith.constant 0 : index
      %16 = vector.load %arg6[%c0_14, %c0_15] : memref<16x128xf32, #tpu.memory_space<vmem>>, vector<16x128xf32>
      tpu.vector_store %arg6[%c0_14, %c0_15], %15 {strides = array<i32>} : memref<16x128xf32, #tpu.memory_space<vmem>>, vector<16x128xf32>,
    } else {
    }
    return
  }
  func.func @transform_0(%arg0: i32, %arg1: i32, %arg2: i32) -> (i32, i32) {
    %c0_i32 = arith.constant 0 : i32
    return %arg0, %arg2 : i32, i32
  }
  func.func @transform_1(%arg0: i32, %arg1: i32, %arg2: i32) -> (i32, i32) {
    %c0_i32 = arith.constant 0 : i32
    return %arg2, %arg1 : i32, i32
  }
  func.func @transform_2(%arg0: i32, %arg1: i32, %arg2: i32) -> (i32, i32) {
    %c0_i32 = arith.constant 0 : i32
    %c0_i32_0 = arith.constant 0 : i32
    return %c0_i32, %arg1 : i32, i32
  }
  func.func @transform_3(%arg0: i32, %arg1: i32, %arg2: i32) -> (i32, i32) {
    %c0_i32 = arith.constant 0 : i32
    return %arg0, %arg1 : i32, i32
  }
}

</mosaic_0001>

<bundles_post_ra>
// kernel: transformer_decoder_forward.21
= control target key start
LH: loop header
LB: loop body
LE: loop exit
PB: predicated region body
PF: predicated region fallthrough
CT: control target
= control target key end

     0   :  { %vm29_vm0 = vcmask 261120   ;;  %vm18_vm1 = vcmask 785408   ;;  %v165_v3 = vmov 0.0   ;;  %s221_s1 = inlined_call_operand.vmem [shape: f32[32,96], index: 1, kind: input, shape index: {}]   ;;  %s222_s0 = inlined_call_operand.vmem [shape: f32[16,32], index: 0, kind: input, shape index: {}]   ;;  %s223_s2 = inlined_call_operand.vmem [shape: f32[1,96], index: 2, kind: input, shape index: {}]   ;;  %s224_s3 = inlined_call_operand.vmem [shape: f32[16,96], index: 3, kind: output, shape index: {}]  }
   0x1   :  { %v25_v0 = vld [vmem:[%s221_s1] sm:$0xff]  ;;  %v26_v1 = vld [vmem:[%s221_s1 + $0x8] sm:$0xff]  ;;  %v27_v2 = vld [vmem:[%s221_s1 + $0x10] sm:$0xff]  ;;  %20 = vst.msk [vmem:[#allocation2 + $0x8] sm:$0xff] %vm18_vm1, %v165_v3 }
   0x2   :  { %19 = vst.msk [vmem:[#allocation2] sm:$0xff] %vm18_vm1, %v165_v3  ;;  %v156_v4 = vpack.c.bf16 %v26_v1, %v25_v0  ;;  %v28_v5 = vld [vmem:[%s221_s1 + $0x18] sm:$0xff]  ;;  %v23_v6 = vld [vmem:[%s222_s0] sm:$0xff]  ;;  %v24_v8 = vld [vmem:[%s222_s0 + $0x8] sm:$0xff] }
   0x3   :  { %v160_v7 = vpack.c.bf16 %v28_v5, %v27_v2  ;;  %153 = vmatprep.mubr.msk.f32.mxu0 %vm29_vm0, %v23_v6  ;;  %v138_v15 = vld [vmem:[%s223_s2] ss:$0 sm:$0xff] }
   0x4   :  { %157 = vmatprep.subr.bf16.mxu0 %v156_v4 }
   0x5   :  { %159 = vmatpush3.bf16.msra.mxu0 %v156_v4 }
   0x6   :  { %161 = vmatprep.subr.bf16.mxu0 %v160_v7 }
   0x8   :  { %v22_v9 = vld [vmem:[#allocation2 + $0x8] sm:$0xff] }
   0x9   :  { %163 = vmatpush3.bf16.msra.mxu0 %v160_v7  ;;  %v21_v10 = vld [vmem:[#allocation2] sm:$0xff] }
   0xc   :  { %154 = vmatmul.mubr.msk.f32.vlgmr.msra.gmra.mrb[0].mxu0 %vm29_vm0, %v24_v8 }
  0xdf   :  { %v155_v11 = vpop.f32.mrb[0].mxu0 }
  0xe0   :  { %v112_v12 = vadd.f32 %v155_v11, %v22_v9  ;;  %v102_v13 = vpop.f32.mrb[1].mxu0 }
  0xe1   :  { %v111_v14 = vadd.f32 %v102_v13, %v21_v10 }
  0xe2   :  { %115 = vst.msk [vmem:[#allocation2 + $0x8] sm:$0xff] %vm18_vm1, %v112_v12 }
  0xe3   :  { %114 = vst.msk [vmem:[#allocation2] sm:$0xff] %vm18_vm1, %v111_v14 }
  0xe9   :  { %v120_v16 = vld [vmem:[#allocation2 + $0x8] sm:$0xff] }
  0xea   :  { %v129_v17 = vadd.f32 %v138_v15, %v120_v16  ;;  %v119_v18 = vld [vmem:[#allocation2] sm:$0xff] }
  0xeb   :  { %v128_v19 = vadd.f32 %v138_v15, %v119_v18 }
  0xec   :  { %131 = vst.msk [vmem:[%s224_s3 + $0x8] sm:$0xff] %vm18_vm1, %v129_v17 }
  0xed   :  { %130 = vst.msk [vmem:[%s224_s3] sm:$0xff] %vm18_vm1, %v128_v19 }

// kernel: transformer_decoder_forward.20
= control target key start
LH: loop header
LB: loop body
LE: loop exit
PB: predicated region body
PF: predicated region fallthrough
CT: control target
= control target key end

     0   :  { %vm23_vm0 = vcmask 261120   ;;  %s136_s0 = inlined_call_operand.vmem [shape: f32[16,32], index: 0, kind: input, shape index: {}]   ;;  %s137_s1 = inlined_call_operand.vmem [shape: f32[16,32], index: 1, kind: input, shape index: {}]   ;;  %s138_s2 = inlined_call_operand.vmem [shape: f32[1,32], index: 2, kind: input, shape index: {}]   ;;  %s139_s3 = inlined_call_operand.vmem [shape: f32[1,32], index: 3, kind: input, shape index: {}]   ;;  %s140_s4 = inlined_call_operand.vmem [shape: f32[16,32], index: 4, kind: output, shape index: {}]  }
   0x1   :  { %v17_v0 = vld [vmem:[%s136_s0] sm:$0xff]  ;;  %v18_v2 = vld [vmem:[%s136_s0 + $0x8] sm:$0xff] }
   0x2   :  { %v19_v1 = vld [vmem:[%s137_s1] sm:$0xff]  ;;  %v20_v4 = vld [vmem:[%s137_s1 + $0x8] sm:$0xff] }
   0x3   :  { %v21_v3 = vadd.f32 %v19_v1, %v17_v0  ;;  %v22_v5 = vadd.f32 %v20_v4, %v18_v2  ;;  %v75_v25 = vld [vmem:[%s138_s2] ss:$0 sm:$0xff] }
   0x4   :  { %v76_v27 = vld [vmem:[%s139_s3] ss:$0 sm:$0xff] }
   0x5   :  { %v24_v6 = vsel %vm23_vm0, %v21_v3, 0.0  ;;  %v27_v7 = vsel %vm23_vm0, %v22_v5, 0.0 }
   0x6   :  { %25 = vadd.xlane.f32.xlu0 %v24_v6 }
   0xa   :  { %28 = vadd.xlane.f32.xlu0 %v27_v7 }
  0x93   :  { %v26_v8 = vpop.xlane.xlu0 %25 }
  0x94   :  { %v31_v9 = vmul.f32 0.03125, %v26_v8 }
  0x96   :  { %v33_v10 = vsub.f32 %v21_v3, %v31_v9 }
  0x97   :  { %v29_v11 = vpop.xlane.xlu0 %28 }
  0x98   :  { %v32_v12 = vmul.f32 0.03125, %v29_v11  ;;  %v35_v13 = vmul.f32 %v33_v10, %v33_v10 }
  0x9a   :  { %v34_v14 = vsub.f32 %v22_v5, %v32_v12  ;;  %v37_v15 = vsel %vm23_vm0, %v35_v13, 0.0 }
  0x9b   :  { %38 = vadd.xlane.f32.xlu1 %v37_v15 }
  0x9c   :  { %v36_v16 = vmul.f32 %v34_v14, %v34_v14 }
  0x9e   :  { %v40_v17 = vsel %vm23_vm0, %v36_v16, 0.0 }
  0x9f   :  { %41 = vadd.xlane.f32.xlu1 %v40_v17 }
 0x128   :  { %v39_v18 = vpop.xlane.xlu1 %38 }
 0x129   :  { %v43_v19 = vmul.f32 0.03125, %v39_v18 }
 0x12b   :  { %v45_v20 = vadd.f32 1e-12, %v43_v19 }
 0x12c   :  { %v42_v21 = vpop.xlane.xlu1 %41 }
 0x12d   :  { %77 = vrsqrt.f32 %v45_v20  ;;  %v44_v22 = vmul.f32 0.03125, %v42_v21 }
 0x12f   :  { %v46_v23 = vadd.f32 1e-12, %v44_v22 }
 0x131   :  { %79 = vrsqrt.f32 %v46_v23 }
 0x137   :  { %v78_v24 = vpop.eup %77 }
 0x138   :  { %v49_v26 = vmul.f32 %v78_v24, %v33_v10 }
 0x13a   :  { %v58_v28 = vmul.f32 %v75_v25, %v49_v26 }
 0x13b   :  { %v80_v29 = vpop.eup %79 }
 0x13c   :  { %v67_v30 = vadd.f32 %v76_v27, %v58_v28  ;;  %v50_v31 = vmul.f32 %v80_v29, %v34_v14 }
 0x13e   :  { %69 = vst.msk [vmem:[%s140_s4] sm:$0xff] %vm23_vm0, %v67_v30  ;;  %v59_v32 = vmul.f32 %v75_v25, %v50_v31 }
 0x140   :  { %v68_v33 = vadd.f32 %v76_v27, %v59_v32 }
 0x142   :  { %70 = vst.msk [vmem:[%s140_s4 + $0x8] sm:$0xff] %vm23_vm0, %v68_v33 }

// kernel: transformer_decoder_forward.23
= control target key start
LH: loop header
LB: loop body
LE: loop exit
PB: predicated region body
PF: predicated region fallthrough
CT: control target
= control target key end

     0   :  { %vm27_vm0 = vcmask 261120   ;;  %v228_v3 = vmov 0.0   ;;  %s315_s1 = inlined_call_operand.vmem [shape: f32[32,32], index: 1, kind: input, shape index: {}]   ;;  %s316_s0 = inlined_call_operand.vmem [shape: f32[16,32], index: 0, kind: input, shape index: {}]   ;;  %s317_s2 = inlined_call_operand.vmem [shape: f32[1,32], index: 2, kind: input, shape index: {}]   ;;  %s318_s3 = inlined_call_operand.vmem [shape: f32[16,32], index: 3, kind: input, shape index: {}]   ;;  %s319_s4 = inlined_call_operand.vmem [shape: f32[1,32], index: 4, kind: input, shape index: {}]   ;;  %s320_s5 = inlined_call_operand.vmem [shape: f32[1,32], index: 5, kind: input, shape index: {}]   ;;  %s321_s6 = inlined_call_operand.vmem [shape: f32[16,32], index: 6, kind: output, shape index: {}]  }
   0x1   :  { %v34_v0 = vld [vmem:[%s315_s1] sm:$0xff]  ;;  %v35_v1 = vld [vmem:[%s315_s1 + $0x8] sm:$0xff]  ;;  %v36_v2 = vld [vmem:[%s315_s1 + $0x10] sm:$0xff]  ;;  %29 = vst.msk [vmem:[#allocation2 + $0x8] sm:$0xff] %vm27_vm0, %v228_v3 }
   0x2   :  { %28 = vst.msk [vmem:[#allocation2] sm:$0xff] %vm27_vm0, %v228_v3  ;;  %v215_v4 = vpack.c.bf16 %v35_v1, %v34_v0  ;;  %v37_v5 = vld [vmem:[%s315_s1 + $0x18] sm:$0xff]  ;;  %v32_v6 = vld [vmem:[%s316_s0] sm:$0xff]  ;;  %v33_v8 = vld [vmem:[%s316_s0 + $0x8] sm:$0xff] }
   0x3   :  { %v219_v7 = vpack.c.bf16 %v37_v5, %v36_v2  ;;  %212 = vmatprep.mubr.msk.f32.mxu0 %vm27_vm0, %v32_v6  ;;  %v195_v15 = vld [vmem:[%s317_s2] ss:$0 sm:$0xff]  ;;  %v139_v21 = vld [vmem:[%s318_s3 + $0x8] sm:$0xff] }
   0x4   :  { %216 = vmatprep.subr.bf16.mxu0 %v215_v4  ;;  %v138_v18 = vld [vmem:[%s318_s3] sm:$0xff] }
   0x5   :  { %218 = vmatpush3.bf16.msra.mxu0 %v215_v4  ;;  %v196_v43 = vld [vmem:[%s319_s4] ss:$0 sm:$0xff] }
   0x6   :  { %220 = vmatprep.subr.bf16.mxu0 %v219_v7  ;;  %v197_v45 = vld [vmem:[%s320_s5] ss:$0 sm:$0xff] }
   0x8   :  { %v31_v9 = vld [vmem:[#allocation2 + $0x8] sm:$0xff] }
   0x9   :  { %222 = vmatpush3.bf16.msra.mxu0 %v219_v7  ;;  %v30_v10 = vld [vmem:[#allocation2] sm:$0xff] }
   0xc   :  { %213 = vmatmul.mubr.msk.f32.vlgmr.msra.gmra.mrb[0].mxu0 %vm27_vm0, %v33_v8 }
  0xdf   :  { %v214_v11 = vpop.f32.mrb[0].mxu0 }
  0xe0   :  { %v121_v12 = vadd.f32 %v214_v11, %v31_v9  ;;  %v111_v13 = vpop.f32.mrb[1].mxu0 }
  0xe1   :  { %v120_v14 = vadd.f32 %v111_v13, %v30_v10 }
  0xe2   :  { %123 = vst.msk [vmem:[#allocation2 + $0x8] sm:$0xff] %vm27_vm0, %v121_v12 }
  0xe3   :  { %122 = vst.msk [vmem:[#allocation2] sm:$0xff] %vm27_vm0, %v120_v14 }
  0xe9   :  { %v128_v16 = vld [vmem:[#allocation2 + $0x8] sm:$0xff] }
  0xea   :  { %v127_v17 = vld [vmem:[#allocation2] sm:$0xff]  ;;  %v137_v20 = vadd.f32 %v195_v15, %v128_v16 }
  0xeb   :  { %v136_v19 = vadd.f32 %v195_v15, %v127_v17 }
  0xec   :  { %v141_v24 = vadd.f32 %v139_v21, %v137_v20 }
  0xed   :  { %v140_v22 = vadd.f32 %v138_v18, %v136_v19 }
  0xee   :  { %v145_v25 = vsel %vm27_vm0, %v141_v24, 0.0 }
  0xef   :  { %v142_v23 = vsel %vm27_vm0, %v140_v22, 0.0 }
  0xf0   :  { %143 = vadd.xlane.f32.xlu0 %v142_v23 }
  0xf4   :  { %146 = vadd.xlane.f32.xlu0 %v145_v25 }
 0x17d   :  { %v144_v26 = vpop.xlane.xlu0 %143 }
 0x17e   :  { %v149_v27 = vmul.f32 0.03125, %v144_v26 }
 0x180   :  { %v151_v28 = vsub.f32 %v140_v22, %v149_v27 }
 0x181   :  { %v147_v29 = vpop.xlane.xlu0 %146 }
 0x182   :  { %v150_v30 = vmul.f32 0.03125, %v147_v29  ;;  %v153_v31 = vmul.f32 %v151_v28, %v151_v28 }
 0x184   :  { %v152_v32 = vsub.f32 %v141_v24, %v150_v30  ;;  %v155_v33 = vsel %vm27_vm0, %v153_v31, 0.0 }
 0x185   :  { %156 = vadd.xlane.f32.xlu1 %v155_v33 }
 0x186   :  { %v154_v34 = vmul.f32 %v152_v32, %v152_v32 }
 0x188   :  { %v158_v35 = vsel %vm27_vm0, %v154_v34, 0.0 }
 0x189   :  { %159 = vadd.xlane.f32.xlu1 %v158_v35 }
 0x212   :  { %v157_v36 = vpop.xlane.xlu1 %156 }
 0x213   :  { %v161_v37 = vmul.f32 0.03125, %v157_v36 }
 0x215   :  { %v163_v38 = vadd.f32 1e-05, %v161_v37 }
 0x216   :  { %v160_v39 = vpop.xlane.xlu1 %159 }
 0x217   :  { %224 = vrsqrt.f32 %v163_v38  ;;  %v162_v40 = vmul.f32 0.03125, %v160_v39 }
 0x219   :  { %v164_v41 = vadd.f32 1e-05, %v162_v40 }
 0x21b   :  { %226 = vrsqrt.f32 %v164_v41 }
 0x221   :  { %v225_v42 = vpop.eup %224 }
 0x222   :  { %v167_v44 = vmul.f32 %v225_v42, %v151_v28 }
 0x224   :  { %v176_v46 = vmul.f32 %v196_v43, %v167_v44 }
 0x225   :  { %v227_v47 = vpop.eup %226 }
 0x226   :  { %v185_v48 = vadd.f32 %v197_v45, %v176_v46  ;;  %v168_v49 = vmul.f32 %v227_v47, %v152_v32 }
 0x228   :  { %187 = vst.msk [vmem:[%s321_s6] sm:$0xff] %vm27_vm0, %v185_v48  ;;  %v177_v50 = vmul.f32 %v196_v43, %v168_v49 }
 0x22a   :  { %v186_v51 = vadd.f32 %v197_v45, %v177_v50 }
 0x22c   :  { %188 = vst.msk [vmem:[%s321_s6 + $0x8] sm:$0xff] %vm27_vm0, %v186_v51 }

// kernel: transformer_decoder_forward.22
= control target key start
LH: loop header
LB: loop body
LE: loop exit
PB: predicated region body
PF: predicated region fallthrough
CT: control target
= control target key end

     0   :  { %s1127_s12 = smov 0   ;;  %s1232_s0 = inlined_call_operand.vmem [shape: f32[2,4,8,8], index: 0, kind: input, shape index: {}]   ;;  %s1233_s1 = inlined_call_operand.vmem [shape: f32[2,4,8,8], index: 1, kind: input, shape index: {}]   ;;  %s1234_s2 = inlined_call_operand.vmem [shape: f32[2,4,8,8], index: 2, kind: input, shape index: {}]   ;;  %s1235_s3 = inlined_call_operand.vmem [shape: f32[2,4,8,8], index: 3, kind: output, shape index: {}]  }
   0x1 LB: > { %s972_s13 = sadd.s32 4294967295, %s1103_s12   ;;  %p976_p0 = scmp.ge.s32.totalorder %s1103_s12, 1  ;;  %s1103_s12 = sphi %s1127_s12, %s13_s12  }
   0x2   : > { %p157_p1 = scmp.lt.s32.totalorder %s1103_s12, 3 }
   0x4   : > { %p158_p2 = pnand %p976_p0, %p157_p1 }
   0x5   : > { %p191_p3 = scmp.lt.s32.totalorder (!%p158_p2), %s972_s13, 1  ;;  %v1105_v0 = vmov (!%p158_p2), 0.0   ;;  %vm1106_vm0 = vmmov (!%p158_p2), 0   ;;  %vm219_vm1 = vcmask (!%p158_p2), 64512   ;;  %v211_v3 = vlaneseq (!%p158_p2) }
   0x6   : > { %161 = sbr.rel (%p158_p2) target bundleno = 1303 (0x517), region = 32  ;;  %1031 = vmatprep.subr.mxu0 (!%p158_p2), %v1105_v0  ;;  %1033 = vmatprep.mubr.msk.f32.mxu0 (!%p158_p2), %vm1106_vm0, %v1105_v0 }
   0x7   : > { %1036 = vmatprep.subr.mxu1 (!%p158_p2), %v1105_v0  ;;  %1038 = vmatprep.mubr.msk.f32.mxu1 (!%p158_p2), %vm1106_vm0, %v1105_v0  ;;  %v212_v4 = vshrl.u32 (!%p158_p2), %v211_v3, 7  ;;  %v214_v5 = vand.u32 (!%p158_p2), 127, %v211_v3 }
   0x9   : > { %vm215_vm2 = vcmp.le.s32.totalorder (!%p158_p2), %v214_v5, %v212_v4 }
   0xd   : > { %s1237_s13 = smov (!%p191_p3, %s972_s13), 1 }
   0xe   : > { %s1141_s14 = sshll.u32 %s1237_s13, 5 }
   0xf   : > { %s1147_s17 = scalar_lea.vmem %s1233_s1, %s1141_s14  ;;  %s1153_s20 = scalar_lea.vmem %s1232_s0, %s1141_s14 }
  0x10   : > { %v217_v1 = vld [vmem:[%s1147_s17] sm:$0xff]  ;;  %s1169_s23 = scalar_lea.vmem %s1234_s2, %s1141_s14  ;;  %v989_v20 = vld [vmem:[%s1147_s17 + $0x8] sm:$0xff]  ;;  %v996_v22 = vld [vmem:[%s1147_s17 + $0x10] sm:$0xff]  ;;  %s1198_s26 = scalar_lea.vmem %s1235_s3, %s1141_s14 }
  0x11   : > { %1032 = vmatpush3.xpose.msk.msra.mxu0 %vm219_vm1, %v217_v1  ;;  %v216_v2 = vld [vmem:[%s1153_s20] sm:$0xff]  ;;  %v988_v21 = vld [vmem:[%s1153_s20 + $0x8] sm:$0xff]  ;;  %v995_v23 = vld [vmem:[%s1153_s20 + $0x10] sm:$0xff] }
  0x12   : > { %1046 = vmatprep.subr.mxu0 %v1105_v0  ;;  %v218_v16 = vld [vmem:[%s1169_s23] sm:$0xff]  ;;  %v1003_v24 = vld [vmem:[%s1147_s17 + $0x18] sm:$0xff]  ;;  %v990_v58 = vld [vmem:[%s1169_s23 + $0x8] sm:$0xff] }
  0x13   : > { %1037 = vmatpush3.msra.mxu1 %v218_v16  ;;  %v1002_v25 = vld [vmem:[%s1153_s20 + $0x18] sm:$0xff]  ;;  %v997_v1 = vld [vmem:[%s1169_s23 + $0x10] sm:$0xff] }
  0x14   : > { %1034 = vmatmul.mubr.msk.f32.vlgmr.msra.gmra.mrb[0].mxu0 %vm219_vm1, %v216_v2  ;;  %1041 = vmatprep.subr.mxu1 %v1105_v0  ;;  %v1004_v4 = vld [vmem:[%s1169_s23 + $0x18] sm:$0xff] }
  0x15   : > { %1048 = vmatprep.mubr.msk.f32.mxu0 %vm1106_vm0, %v1105_v0  ;;  %1047 = vmatpush3.msra.mxu0 %v990_v58 }
  0x16   : > { %1056 = vmatprep.subr.mxu0 %v1105_v0 }
  0xe7   : > { %v292_v6 = vpop.f32.mrb[0].mxu0 }
  0xe8   : > { %v296_v7 = vmul.f32 0.35355338, %v292_v6  ;;  %v1035_v8 = vpop.f32.mrb[1].mxu0 }
  0xea   : > { %v297_v9 = vsel %vm215_vm2, %v296_v7, -1e+30 }
  0xeb   : > { %v298_v10 = vsel %vm219_vm1, %v297_v9, -inf }
  0xec   : > { %299 = vmax.xlane.f32.xlu0 %v298_v10 }
 0x179   : > { %v300_v11 = vpop.xlane.xlu0 %299 }
 0x17a   : > { %v301_v12 = vsub.f32 %v297_v9, %v300_v11 }
 0x17c   : > { %v302_v13 = vmul.f32 1.442695, %v301_v12 }
 0x17e   : > { %1081 = vpow2.f32 %v302_v13 }
 0x188   : > { %v1082_v14 = vpop.eup %1081 }
 0x189   : > { %v304_v15 = vsel %vm219_vm1, %v1082_v14, 0.0 }
 0x18a   : > { %305 = vadd.xlane.f32.xlu0 %v304_v15 }
 0x217   : > { %v306_v17 = vpop.xlane.xlu0 %305 }
 0x218   : > { %1083 = vrcp.f32 %v306_v17 }
 0x222   : > { %v1084_v18 = vpop.eup %1083 }
 0x223   : > { %v308_v19 = vmul.f32 %v1084_v18, %v1082_v14 }
 0x225   : > { %1039 = vmatmul.mubr.msk.f32.vlgmr.msra.gmra.mrb[0].mxu1 %vm219_vm1, %v308_v19 }
 0x226   : > { %1042 = vmatpush3.xpose.msk.msra.mxu1 %vm219_vm1, %v989_v20  ;;  %1043 = vmatprep.mubr.msk.f32.mxu1 %vm1106_vm0, %v1105_v0 }
 0x227   : > { %1051 = vmatprep.subr.mxu1 %v1105_v0 }
 0x229   : > { %1044 = vmatmul.mubr.msk.f32.vlgmr.msra.gmra.mrb[2].mxu1 %vm219_vm1, %v988_v21 }
 0x22a   : > { %1052 = vmatpush3.xpose.msk.msra.mxu1 %vm219_vm1, %v996_v22  ;;  %1053 = vmatprep.mubr.msk.f32.mxu1 %vm1106_vm0, %v1105_v0 }
 0x22b   : > { %1061 = vmatprep.subr.mxu1 %v1105_v0 }
 0x22d   : > { %1054 = vmatmul.mubr.msk.f32.vlgmr.msra.gmra.mrb[4].mxu1 %vm219_vm1, %v995_v23 }
 0x22e   : > { %1062 = vmatpush3.xpose.msk.msra.mxu1 %vm219_vm1, %v1003_v24  ;;  %1063 = vmatprep.mubr.msk.f32.mxu1 %vm1106_vm0, %v1105_v0 }
 0x231   : > { %1064 = vmatmul.mubr.msk.f32.vlgmr.msra.gmra.mrb[6].mxu1 %vm219_vm1, %v1002_v25 }
 0x2f8   : > { %v378_v26 = vpop.f32.mrb[0].mxu1 }
 0x2f9   : > { %382 = vst.msk [vmem:[%s1198_s26] sm:$0xff] %vm219_vm1, %v378_v26  ;;  %v1040_v27 = vpop.f32.mrb[1].mxu1 }
 0x2fc   : > { %v461_v28 = vpop.f32.mrb[2].mxu1 }
 0x2fd   : > { %v465_v29 = vmul.f32 0.35355338, %v461_v28  ;;  %v1045_v30 = vpop.f32.mrb[3].mxu1 }
 0x2ff   : > { %v466_v31 = vsel %vm215_vm2, %v465_v29, -1e+30 }
 0x300   : > { %v631_v32 = vpop.f32.mrb[4].mxu1  ;;  %v467_v33 = vsel %vm219_vm1, %v466_v31, -inf }
 0x301   : > { %v635_v34 = vmul.f32 0.35355338, %v631_v32  ;;  %468 = vmax.xlane.f32.xlu1 %v467_v33  ;;  %v1055_v35 = vpop.f32.mrb[5].mxu1 }
 0x303   : > { %v636_v36 = vsel %vm215_vm2, %v635_v34, -1e+30 }
 0x304   : > { %v801_v37 = vpop.f32.mrb[6].mxu1  ;;  %v637_v38 = vsel %vm219_vm1, %v636_v36, -inf }
 0x305   : > { %v805_v39 = vmul.f32 0.35355338, %v801_v37  ;;  %638 = vmax.xlane.f32.xlu1 %v637_v38  ;;  %v1065_v40 = vpop.f32.mrb[7].mxu1 }
 0x307   : > { %v806_v41 = vsel %vm215_vm2, %v805_v39, -1e+30 }
 0x308   : > { %v807_v42 = vsel %vm219_vm1, %v806_v41, -inf }
 0x309   : > { %808 = vmax.xlane.f32.xlu0 %v807_v42 }
 0x38e   : > { %v469_v43 = vpop.xlane.xlu1 %468 }
 0x38f   : > { %v470_v44 = vsub.f32 %v466_v31, %v469_v43 }
 0x391   : > { %v471_v45 = vmul.f32 1.442695, %v470_v44 }
 0x392   : > { %v639_v46 = vpop.xlane.xlu1 %638 }
 0x393   : > { %1085 = vpow2.f32 %v471_v45  ;;  %v640_v47 = vsub.f32 %v636_v36, %v639_v46 }
 0x395   : > { %v641_v48 = vmul.f32 1.442695, %v640_v47 }
 0x396   : > { %v809_v49 = vpop.xlane.xlu0 %808 }
 0x397   : > { %1087 = vpow2.f32 %v641_v48  ;;  %v810_v50 = vsub.f32 %v806_v41, %v809_v49 }
 0x399   : > { %v811_v51 = vmul.f32 1.442695, %v810_v50 }
 0x39b   : > { %1089 = vpow2.f32 %v811_v51 }
 0x39d   : > { %v1086_v52 = vpop.eup %1085 }
 0x39e   : > { %v473_v53 = vsel %vm219_vm1, %v1086_v52, 0.0 }
 0x39f   : > { %474 = vadd.xlane.f32.xlu1 %v473_v53 }
 0x3a1   : > { %v1088_v54 = vpop.eup %1087 }
 0x3a2   : > { %v643_v55 = vsel %vm219_vm1, %v1088_v54, 0.0 }
 0x3a3   : > { %644 = vadd.xlane.f32.xlu0 %v643_v55 }
 0x3a5   : > { %v1090_v56 = vpop.eup %1089 }
 0x3a6   : > { %v813_v57 = vsel %vm219_vm1, %v1090_v56, 0.0 }
 0x3a7   : > { %814 = vadd.xlane.f32.xlu1 %v813_v57 }
 0x42c   : > { %v475_v59 = vpop.xlane.xlu1 %474 }
 0x42d   : > { %1091 = vrcp.f32 %v475_v59 }
 0x430   : > { %v645_v60 = vpop.xlane.xlu0 %644 }
 0x431   : > { %1093 = vrcp.f32 %v645_v60 }
 0x434   : > { %v815_v61 = vpop.xlane.xlu1 %814 }
 0x435   : > { %1095 = vrcp.f32 %v815_v61 }
 0x437   : > { %v1092_v62 = vpop.eup %1091 }
 0x438   : > { %v477_v63 = vmul.f32 %v1092_v62, %v1086_v52 }
 0x43a   : > { %1049 = vmatmul.mubr.msk.f32.vlgmr.msra.gmra.mrb[2].mxu0 %vm219_vm1, %v477_v63 }
 0x43b   : > { %v1094_v2 = vpop.eup %1093  ;;  %1057 = vmatpush3.msra.mxu0 %v997_v1  ;;  %1058 = vmatprep.mubr.msk.f32.mxu0 %vm1106_vm0, %v1105_v0 }
 0x43c   : > { %v647_v3 = vmul.f32 %v1094_v2, %v1088_v54  ;;  %1066 = vmatprep.subr.mxu0 %v1105_v0 }
 0x43e   : > { %1059 = vmatmul.mubr.msk.f32.vlgmr.msra.gmra.mrb[4].mxu0 %vm219_vm1, %v647_v3 }
 0x43f   : > { %v1096_v5 = vpop.eup %1095  ;;  %1067 = vmatpush3.msra.mxu0 %v1004_v4  ;;  %1068 = vmatprep.mubr.msk.f32.mxu0 %vm1106_vm0, %v1105_v0 }
 0x440   : > { %v817_v6 = vmul.f32 %v1096_v5, %v1090_v56 }
 0x442   : > { %1069 = vmatmul.mubr.msk.f32.vlgmr.msra.gmra.mrb[6].mxu0 %vm219_vm1, %v817_v6 }
 0x50d   : > { %v547_v7 = vpop.f32.mrb[2].mxu0 }
 0x50e   : > { %994 = vst.msk [vmem:[%s1198_s26 + $0x8] sm:$0xff] %vm219_vm1, %v547_v7  ;;  %v1050_v8 = vpop.f32.mrb[3].mxu0 }
 0x511   : > { %v717_v9 = vpop.f32.mrb[4].mxu0 }
 0x512   : > { %1001 = vst.msk [vmem:[%s1198_s26 + $0x10] sm:$0xff] %vm219_vm1, %v717_v9  ;;  %v1060_v10 = vpop.f32.mrb[5].mxu0 }
 0x515   : > { %v887_v11 = vpop.f32.mrb[6].mxu0 }
 0x516   : > { %1008 = vst.msk [vmem:[%s1198_s26 + $0x18] sm:$0xff] %vm219_vm1, %v887_v11  ;;  %v1070_v12 = vpop.f32.mrb[7].mxu0 }
 0x517 PF: > { %s13_s12 = sadd.s32 1, %s1103_s12  }
 0x518   : > { %p10_p4 = scmp.ge.s32.totalorder %s13_s12, 4  }
 0x51a   :  { %12 = sbr.rel (!%p10_p4) target bundleno = 1 (0x1), region = 80 }

// kernel: transformer_decoder_forward.24
= control target key start
LH: loop header
LB: loop body
LE: loop exit
PB: predicated region body
PF: predicated region fallthrough
CT: control target
= control target key end

     0   :  { %vm18_vm0 = vcmask 261120   ;;  %v164_v3 = vmov 0.0   ;;  %s220_s1 = inlined_call_operand.vmem [shape: f32[32,32], index: 1, kind: input, shape index: {}]   ;;  %s221_s0 = inlined_call_operand.vmem [shape: f32[16,32], index: 0, kind: input, shape index: {}]   ;;  %s222_s2 = inlined_call_operand.vmem [shape: f32[1,32], index: 2, kind: input, shape index: {}]   ;;  %s223_s3 = inlined_call_operand.vmem [shape: f32[16,32], index: 3, kind: output, shape index: {}]  }
   0x1   :  { %v25_v0 = vld [vmem:[%s220_s1] sm:$0xff]  ;;  %v26_v1 = vld [vmem:[%s220_s1 + $0x8] sm:$0xff]  ;;  %v27_v2 = vld [vmem:[%s220_s1 + $0x10] sm:$0xff]  ;;  %20 = vst.msk [vmem:[#allocation2 + $0x8] sm:$0xff] %vm18_vm0, %v164_v3 }
   0x2   :  { %19 = vst.msk [vmem:[#allocation2] sm:$0xff] %vm18_vm0, %v164_v3  ;;  %v155_v4 = vpack.c.bf16 %v26_v1, %v25_v0  ;;  %v28_v5 = vld [vmem:[%s220_s1 + $0x18] sm:$0xff]  ;;  %v23_v6 = vld [vmem:[%s221_s0] sm:$0xff]  ;;  %v24_v8 = vld [vmem:[%s221_s0 + $0x8] sm:$0xff] }
   0x3   :  { %v159_v7 = vpack.c.bf16 %v28_v5, %v27_v2  ;;  %152 = vmatprep.mubr.msk.f32.mxu0 %vm18_vm0, %v23_v6  ;;  %v137_v15 = vld [vmem:[%s222_s2] ss:$0 sm:$0xff] }
   0x4   :  { %156 = vmatprep.subr.bf16.mxu0 %v155_v4 }
   0x5   :  { %158 = vmatpush3.bf16.msra.mxu0 %v155_v4 }
   0x6   :  { %160 = vmatprep.subr.bf16.mxu0 %v159_v7 }
   0x8   :  { %v22_v9 = vld [vmem:[#allocation2 + $0x8] sm:$0xff] }
   0x9   :  { %162 = vmatpush3.bf16.msra.mxu0 %v159_v7  ;;  %v21_v10 = vld [vmem:[#allocation2] sm:$0xff] }
   0xc   :  { %153 = vmatmul.mubr.msk.f32.vlgmr.msra.gmra.mrb[0].mxu0 %vm18_vm0, %v24_v8 }
  0xdf   :  { %v154_v11 = vpop.f32.mrb[0].mxu0 }
  0xe0   :  { %v112_v12 = vadd.f32 %v154_v11, %v22_v9  ;;  %v102_v13 = vpop.f32.mrb[1].mxu0 }
  0xe1   :  { %v111_v14 = vadd.f32 %v102_v13, %v21_v10 }
  0xe2   :  { %114 = vst.msk [vmem:[#allocation2 + $0x8] sm:$0xff] %vm18_vm0, %v112_v12 }
  0xe3   :  { %113 = vst.msk [vmem:[#allocation2] sm:$0xff] %vm18_vm0, %v111_v14 }
  0xe9   :  { %v119_v16 = vld [vmem:[#allocation2 + $0x8] sm:$0xff] }
  0xea   :  { %v128_v17 = vadd.f32 %v137_v15, %v119_v16  ;;  %v118_v18 = vld [vmem:[#allocation2] sm:$0xff] }
  0xeb   :  { %v127_v19 = vadd.f32 %v137_v15, %v118_v18 }
  0xec   :  { %130 = vst.msk [vmem:[%s223_s3 + $0x8] sm:$0xff] %vm18_vm0, %v128_v17 }
  0xed   :  { %129 = vst.msk [vmem:[%s223_s3] sm:$0xff] %vm18_vm0, %v127_v19 }

// kernel: transformer_decoder_forward.25
= control target key start
LH: loop header
LB: loop body
LE: loop exit
PB: predicated region body
PF: predicated region fallthrough
CT: control target
= control target key end

     0   :  { %vm29_vm0 = vcmask 261120   ;;  %vm18_vm1 = vcmask 523264   ;;  %v165_v3 = vmov 0.0   ;;  %s221_s1 = inlined_call_operand.vmem [shape: f32[32,64], index: 1, kind: input, shape index: {}]   ;;  %s222_s0 = inlined_call_operand.vmem [shape: f32[16,32], index: 0, kind: input, shape index: {}]   ;;  %s223_s2 = inlined_call_operand.vmem [shape: f32[1,64], index: 2, kind: input, shape index: {}]   ;;  %s224_s3 = inlined_call_operand.vmem [shape: f32[16,64], index: 3, kind: output, shape index: {}]  }
   0x1   :  { %v25_v0 = vld [vmem:[%s221_s1] sm:$0xff]  ;;  %v26_v1 = vld [vmem:[%s221_s1 + $0x8] sm:$0xff]  ;;  %v27_v2 = vld [vmem:[%s221_s1 + $0x10] sm:$0xff]  ;;  %20 = vst.msk [vmem:[#allocation2 + $0x8] sm:$0xff] %vm18_vm1, %v165_v3 }
   0x2   :  { %19 = vst.msk [vmem:[#allocation2] sm:$0xff] %vm18_vm1, %v165_v3  ;;  %v156_v4 = vpack.c.bf16 %v26_v1, %v25_v0  ;;  %v28_v5 = vld [vmem:[%s221_s1 + $0x18] sm:$0xff]  ;;  %v23_v6 = vld [vmem:[%s222_s0] sm:$0xff]  ;;  %v24_v8 = vld [vmem:[%s222_s0 + $0x8] sm:$0xff] }
   0x3   :  { %v160_v7 = vpack.c.bf16 %v28_v5, %v27_v2  ;;  %153 = vmatprep.mubr.msk.f32.mxu0 %vm29_vm0, %v23_v6  ;;  %v138_v15 = vld [vmem:[%s223_s2] ss:$0 sm:$0xff] }
   0x4   :  { %157 = vmatprep.subr.bf16.mxu0 %v156_v4 }
   0x5   :  { %159 = vmatpush3.bf16.msra.mxu0 %v156_v4 }
   0x6   :  { %161 = vmatprep.subr.bf16.mxu0 %v160_v7 }
   0x8   :  { %v22_v9 = vld [vmem:[#allocation2 + $0x8] sm:$0xff] }
   0x9   :  { %163 = vmatpush3.bf16.msra.mxu0 %v160_v7  ;;  %v21_v10 = vld [vmem:[#allocation2] sm:$0xff] }
   0xc   :  { %154 = vmatmul.mubr.msk.f32.vlgmr.msra.gmra.mrb[0].mxu0 %vm29_vm0, %v24_v8 }
  0xdf   :  { %v155_v11 = vpop.f32.mrb[0].mxu0 }
  0xe0   :  { %v112_v12 = vadd.f32 %v155_v11, %v22_v9  ;;  %v102_v13 = vpop.f32.mrb[1].mxu0 }
  0xe1   :  { %v111_v14 = vadd.f32 %v102_v13, %v21_v10 }
  0xe2   :  { %115 = vst.msk [vmem:[#allocation2 + $0x8] sm:$0xff] %vm18_vm1, %v112_v12 }
  0xe3   :  { %114 = vst.msk [vmem:[#allocation2] sm:$0xff] %vm18_vm1, %v111_v14 }
  0xe9   :  { %v120_v16 = vld [vmem:[#allocation2 + $0x8] sm:$0xff] }
  0xea   :  { %v129_v17 = vadd.f32 %v138_v15, %v120_v16  ;;  %v119_v18 = vld [vmem:[#allocation2] sm:$0xff] }
  0xeb   :  { %v128_v19 = vadd.f32 %v138_v15, %v119_v18 }
  0xec   :  { %131 = vst.msk [vmem:[%s224_s3 + $0x8] sm:$0xff] %vm18_vm1, %v129_v17 }
  0xed   :  { %130 = vst.msk [vmem:[%s224_s3] sm:$0xff] %vm18_vm1, %v128_v19 }

// kernel: transformer_decoder_forward.39
= control target key start
LH: loop header
LB: loop body
LE: loop exit
PB: predicated region body
PF: predicated region fallthrough
CT: control target
= control target key end

     0   :  { %vm29_vm0 = vcmask 261120   ;;  %s258_s0 = inlined_call_operand.vmem [shape: f32[16,32], index: 0, kind: input, shape index: {}]   ;;  %s259_s1 = inlined_call_operand.vmem [shape: f32[32,128], index: 1, kind: input, shape index: {}]   ;;  %s260_s2 = inlined_call_operand.vmem [shape: f32[1,128], index: 2, kind: input, shape index: {}]   ;;  %s261_s3 = inlined_call_operand.hbm [shape: f32[16,128], index: 3, kind: output, shape index: {}]  }
   0x1   :  { %v25_v0 = vld [vmem:[%s259_s1] sm:$0xff]  ;;  %v26_v1 = vld [vmem:[%s259_s1 + $0x8] sm:$0xff]  ;;  %v27_v2 = vld [vmem:[%s259_s1 + $0x10] sm:$0xff] }
   0x2   :  { %v167_v3 = vpack.c.bf16 %v26_v1, %v25_v0  ;;  %v28_v4 = vld [vmem:[%s259_s1 + $0x18] sm:$0xff]  ;;  %v23_v5 = vld [vmem:[%s258_s0] sm:$0xff] }
   0x3   :  { %v171_v6 = vpack.c.bf16 %v28_v4, %v27_v2  ;;  %164 = vmatprep.mubr.msk.f32.mxu0 %vm29_vm0, %v23_v5 }
   0x4   :  { %8 = vsyncpa [#allocation4], 0  ;;  %168 = vmatprep.subr.bf16.mxu0 %v167_v3  ;;  %v24_v7 = vld [vmem:[%s258_s0 + $0x8] sm:$0xff]  ;;  %v149_v8 = vld [vmem:[%s260_s2] ss:$0 sm:$0xff]  ;;  %s202_s1 = smov [#allocation3]  }
   0x5   :  { %170 = vmatpush3.bf16.msra.mxu0 %v167_v3  ;;  %s136_s26 = sshll.u32 %s202_s1, 4  ;;  %s137_s26 = int_to_ptr.vmem [resolvable:$true] %s136_s26 }
   0x6   :  { %172 = vmatprep.subr.bf16.mxu0 %v171_v6  ;;  %s178_s27 = scalar_lea.vmem %s137_s26, 256  ;;  %p183_p1 = scmp.lt.s32.totalorder %s137_s26, %s137_s26 }
   0x7   :  { %p179_p0 = scmp.ne.s32.totalorder %s137_s26, %s178_s27  ;;  %p184_p2 = scmp.lt.s32.totalorder %s178_s27, %s178_s27 }
   0x9   :  { %174 = vmatpush3.bf16.msra.mxu0 %v171_v6  ;;  %p185_p3 = por %p184_p2, %p183_p1 }
   0xb   :  { %p186_p4 = pnand %p185_p3, %p179_p0 }
   0xc   :  { %165 = vmatmul.mubr.msk.f32.vlgmr.msra.gmra.mrb[0].mxu0 %vm29_vm0, %v24_v7 }
  0xdf   :  { %v166_v9 = vpop.f32.mrb[0].mxu0 }
  0xe0   :  { %v128_v10 = vadd.f32 %v166_v9, %v149_v8  ;;  %v102_v11 = vpop.f32.mrb[1].mxu0 }
  0xe1   :  { %v127_v12 = vadd.f32 %v149_v8, %v102_v11 }
  0xe2   :  { %130 = vst [vmem:[#allocation3 + $0x8] sm:$0xff] %v128_v10 }
  0xe3   :  { %129 = vst [vmem:[#allocation3] sm:$0xff] %v127_v12 }
  0xe4   :  { %189 = shalt.err (!%p186_p4)
}
  0xe5   :  { %s190_s2 = scalar_lea.hbm %s261_s3, 256 }
  0xe6   :  { %p191_p5 = scmp.ne.s32.totalorder %s261_s3, %s190_s2  ;;  %p194_p6 = scmp.lt.u32.totalorder %s190_s2, %s261_s3 }
  0xe8   :  { %p196_p7 = pnand %p194_p6, %p191_p5 }
  0xea   :  { %199 = shalt.err (!%p196_p7)
}
  0xeb   :  { %s203_s6 = smov 128   ;;  %s204_s7 = smov 8  }
  0xec   :  { %142 = dma.vmem_to_hbm [thread:$0]  %s137_s26, 256, %s261_s3, [#allocation4], %s203_s6, %s203_s6, %s204_s7  }
  0xed   :  { %200 = dma.done.wait [#allocation4], 256  }
  0xee   :  { %201 = vsyncadd [#allocation4], 4294967040 }
  0xef   :  { %146 = vsyncpa [#allocation4], 1 }

// kernel: transformer_decoder_forward.29
= control target key start
LH: loop header
LB: loop body
LE: loop exit
PB: predicated region body
PF: predicated region fallthrough
CT: control target
= control target key end

     0   :  { %vm27_vm0 = vcmask 261120   ;;  %vm42_vm1 = vcmask 523264   ;;  %v253_v3 = vmov 0.0   ;;  %s352_s1 = inlined_call_operand.vmem [shape: f32[64,32], index: 1, kind: input, shape index: {}]   ;;  %s353_s0 = inlined_call_operand.vmem [shape: f32[16,64], index: 0, kind: input, shape index: {}]   ;;  %s354_s2 = inlined_call_operand.vmem [shape: f32[1,32], index: 2, kind: input, shape index: {}]   ;;  %s355_s3 = inlined_call_operand.vmem [shape: f32[16,32], index: 3, kind: input, shape index: {}]   ;;  %s356_s4 = inlined_call_operand.vmem [shape: f32[1,32], index: 4, kind: input, shape index: {}]   ;;  %s357_s5 = inlined_call_operand.vmem [shape: f32[1,32], index: 5, kind: input, shape index: {}]   ;;  %s358_s6 = inlined_call_operand.vmem [shape: f32[16,32], index: 6, kind: output, shape index: {}]  }
   0x1   :  { %v34_v0 = vld [vmem:[%s352_s1] sm:$0xff]  ;;  %v35_v1 = vld [vmem:[%s352_s1 + $0x8] sm:$0xff]  ;;  %v36_v2 = vld [vmem:[%s352_s1 + $0x10] sm:$0xff]  ;;  %29 = vst.msk [vmem:[#allocation2 + $0x8] sm:$0xff] %vm27_vm0, %v253_v3 }
   0x2   :  { %28 = vst.msk [vmem:[#allocation2] sm:$0xff] %vm27_vm0, %v253_v3  ;;  %v232_v4 = vpack.c.bf16 %v35_v1, %v34_v0  ;;  %v37_v5 = vld [vmem:[%s352_s1 + $0x18] sm:$0xff]  ;;  %v38_v7 = vld [vmem:[%s352_s1 + $0x20] sm:$0xff]  ;;  %v39_v8 = vld [vmem:[%s352_s1 + $0x28] sm:$0xff] }
   0x3   :  { %v236_v6 = vpack.c.bf16 %v37_v5, %v36_v2  ;;  %v32_v9 = vld [vmem:[%s353_s0] sm:$0xff]  ;;  %v240_v10 = vpack.c.bf16 %v39_v8, %v38_v7  ;;  %v40_v11 = vld [vmem:[%s352_s1 + $0x30] sm:$0xff]  ;;  %v41_v12 = vld [vmem:[%s352_s1 + $0x38] sm:$0xff] }
   0x4   :  { %233 = vmatprep.subr.bf16.mxu0 %v232_v4  ;;  %229 = vmatprep.mubr.msk.f32.mxu0 %vm42_vm1, %v32_v9  ;;  %v244_v13 = vpack.c.bf16 %v41_v12, %v40_v11  ;;  %v33_v14 = vld [vmem:[%s353_s0 + $0x8] sm:$0xff]  ;;  %v200_v21 = vld [vmem:[%s354_s2] ss:$0 sm:$0xff] }
   0x5   :  { %235 = vmatpush3.bf16.msra.mxu0 %v232_v4  ;;  %v143_v24 = vld [vmem:[%s355_s3] sm:$0xff]  ;;  %v144_v27 = vld [vmem:[%s355_s3 + $0x8] sm:$0xff] }
   0x6   :  { %237 = vmatprep.subr.bf16.mxu0 %v236_v6  ;;  %v201_v49 = vld [vmem:[%s356_s4] ss:$0 sm:$0xff] }
   0x7   :  { %v202_v51 = vld [vmem:[%s357_s5] ss:$0 sm:$0xff] }
   0x8   :  { %v31_v15 = vld [vmem:[#allocation2 + $0x8] sm:$0xff] }
   0x9   :  { %239 = vmatpush3.bf16.msra.mxu0 %v236_v6  ;;  %v30_v16 = vld [vmem:[#allocation2] sm:$0xff] }
   0xa   :  { %241 = vmatprep.subr.bf16.mxu0 %v240_v10 }
   0xd   :  { %243 = vmatpush3.bf16.msra.mxu0 %v240_v10 }
   0xe   :  { %245 = vmatprep.subr.bf16.mxu0 %v244_v13 }
  0x11   :  { %247 = vmatpush3.bf16.msra.mxu0 %v244_v13 }
  0x14   :  { %230 = vmatmul.mubr.msk.f32.vlgmr.msra.gmra.mrb[0].mxu0 %vm42_vm1, %v33_v14 }
  0xe7   :  { %v231_v17 = vpop.f32.mrb[0].mxu0 }
  0xe8   :  { %v125_v18 = vadd.f32 %v231_v17, %v31_v15  ;;  %v115_v19 = vpop.f32.mrb[1].mxu0 }
  0xe9   :  { %v124_v20 = vadd.f32 %v115_v19, %v30_v16 }
  0xea   :  { %128 = vst.msk [vmem:[#allocation2 + $0x8] sm:$0xff] %vm27_vm0, %v125_v18 }
  0xeb   :  { %127 = vst.msk [vmem:[#allocation2] sm:$0xff] %vm27_vm0, %v124_v20 }
  0xf1   :  { %v133_v22 = vld [vmem:[#allocation2 + $0x8] sm:$0xff] }
  0xf2   :  { %v132_v23 = vld [vmem:[#allocation2] sm:$0xff]  ;;  %v142_v26 = vadd.f32 %v200_v21, %v133_v22 }
  0xf3   :  { %v141_v25 = vadd.f32 %v200_v21, %v132_v23 }
  0xf4   :  { %v146_v30 = vadd.f32 %v144_v27, %v142_v26 }
  0xf5   :  { %v145_v28 = vadd.f32 %v143_v24, %v141_v25 }
  0xf6   :  { %v150_v31 = vsel %vm27_vm0, %v146_v30, 0.0 }
  0xf7   :  { %v147_v29 = vsel %vm27_vm0, %v145_v28, 0.0 }
  0xf8   :  { %148 = vadd.xlane.f32.xlu0 %v147_v29 }
  0xfc   :  { %151 = vadd.xlane.f32.xlu0 %v150_v31 }
 0x185   :  { %v149_v32 = vpop.xlane.xlu0 %148 }
 0x186   :  { %v154_v33 = vmul.f32 0.03125, %v149_v32 }
 0x188   :  { %v156_v34 = vsub.f32 %v145_v28, %v154_v33 }
 0x189   :  { %v152_v35 = vpop.xlane.xlu0 %151 }
 0x18a   :  { %v155_v36 = vmul.f32 0.03125, %v152_v35  ;;  %v158_v37 = vmul.f32 %v156_v34, %v156_v34 }
 0x18c   :  { %v157_v38 = vsub.f32 %v146_v30, %v155_v36  ;;  %v160_v39 = vsel %vm27_vm0, %v158_v37, 0.0 }
 0x18d   :  { %161 = vadd.xlane.f32.xlu1 %v160_v39 }
 0x18e   :  { %v159_v40 = vmul.f32 %v157_v38, %v157_v38 }
 0x190   :  { %v163_v41 = vsel %vm27_vm0, %v159_v40, 0.0 }
 0x191   :  { %164 = vadd.xlane.f32.xlu1 %v163_v41 }
 0x21a   :  { %v162_v42 = vpop.xlane.xlu1 %161 }
 0x21b   :  { %v166_v43 = vmul.f32 0.03125, %v162_v42 }
 0x21d   :  { %v168_v44 = vadd.f32 1e-05, %v166_v43 }
 0x21e   :  { %v165_v45 = vpop.xlane.xlu1 %164 }
 0x21f   :  { %249 = vrsqrt.f32 %v168_v44  ;;  %v167_v46 = vmul.f32 0.03125, %v165_v45 }
 0x221   :  { %v169_v47 = vadd.f32 1e-05, %v167_v46 }
 0x223   :  { %251 = vrsqrt.f32 %v169_v47 }
 0x229   :  { %v250_v48 = vpop.eup %249 }
 0x22a   :  { %v172_v50 = vmul.f32 %v250_v48, %v156_v34 }
 0x22c   :  { %v181_v52 = vmul.f32 %v201_v49, %v172_v50 }
 0x22d   :  { %v252_v53 = vpop.eup %251 }
 0x22e   :  { %v190_v54 = vadd.f32 %v202_v51, %v181_v52  ;;  %v173_v55 = vmul.f32 %v252_v53, %v157_v38 }
 0x230   :  { %192 = vst.msk [vmem:[%s358_s6] sm:$0xff] %vm27_vm0, %v190_v54  ;;  %v182_v56 = vmul.f32 %v201_v49, %v173_v55 }
 0x232   :  { %v191_v57 = vadd.f32 %v202_v51, %v182_v56 }
 0x234   :  { %193 = vst.msk [vmem:[%s358_s6 + $0x8] sm:$0xff] %vm27_vm0, %v191_v57 }

// kernel: transformer_decoder_forward.26
= control target key start
LH: loop header
LB: loop body
LE: loop exit
PB: predicated region body
PF: predicated region fallthrough
CT: control target
= control target key end

     0   :  { %s1118_s12 = smov 0   ;;  %s1219_s0 = inlined_call_operand.vmem [shape: f32[2,4,8,8], index: 0, kind: input, shape index: {}]   ;;  %s1220_s1 = inlined_call_operand.vmem [shape: f32[2,4,8,8], index: 1, kind: input, shape index: {}]   ;;  %s1221_s2 = inlined_call_operand.vmem [shape: f32[2,4,8,8], index: 2, kind: input, shape index: {}]   ;;  %s1222_s3 = inlined_call_operand.vmem [shape: f32[2,4,8,8], index: 3, kind: output, shape index: {}]  }
   0x1 LB: > { %s963_s13 = sadd.s32 4294967295, %s1094_s12   ;;  %p967_p0 = scmp.ge.s32.totalorder %s1094_s12, 1  ;;  %s1094_s12 = sphi %s1118_s12, %s13_s12  }
   0x2   : > { %p157_p1 = scmp.lt.s32.totalorder %s1094_s12, 3 }
   0x4   : > { %p158_p2 = pnand %p967_p0, %p157_p1 }
   0x5   : > { %p191_p3 = scmp.lt.s32.totalorder (!%p158_p2), %s963_s13, 1  ;;  %v1096_v0 = vmov (!%p158_p2), 0.0   ;;  %vm1097_vm0 = vmmov (!%p158_p2), 0   ;;  %vm214_vm1 = vcmask (!%p158_p2), 64512  }
   0x6   : > { %161 = sbr.rel (%p158_p2) target bundleno = 1301 (0x515), region = 32  ;;  %1022 = vmatprep.subr.mxu0 (!%p158_p2), %v1096_v0  ;;  %1024 = vmatprep.mubr.msk.f32.mxu0 (!%p158_p2), %vm1097_vm0, %v1096_v0 }
   0x7   : > { %1027 = vmatprep.subr.mxu1 (!%p158_p2), %v1096_v0  ;;  %1029 = vmatprep.mubr.msk.f32.mxu1 (!%p158_p2), %vm1097_vm0, %v1096_v0 }
   0xd   : > { %s1224_s13 = smov (!%p191_p3, %s963_s13), 1 }
   0xe   : > { %s1132_s14 = sshll.u32 %s1224_s13, 5 }
   0xf   : > { %s1138_s17 = scalar_lea.vmem %s1220_s1, %s1132_s14  ;;  %s1144_s20 = scalar_lea.vmem %s1219_s0, %s1132_s14 }
  0x10   : > { %v212_v1 = vld [vmem:[%s1138_s17] sm:$0xff]  ;;  %s1159_s23 = scalar_lea.vmem %s1221_s2, %s1132_s14  ;;  %v980_v16 = vld [vmem:[%s1138_s17 + $0x8] sm:$0xff]  ;;  %v987_v18 = vld [vmem:[%s1138_s17 + $0x10] sm:$0xff]  ;;  %s1188_s26 = scalar_lea.vmem %s1222_s3, %s1132_s14 }
  0x11   : > { %1023 = vmatpush3.xpose.msk.msra.mxu0 %vm214_vm1, %v212_v1  ;;  %v211_v2 = vld [vmem:[%s1144_s20] sm:$0xff]  ;;  %v979_v17 = vld [vmem:[%s1144_s20 + $0x8] sm:$0xff]  ;;  %v986_v19 = vld [vmem:[%s1144_s20 + $0x10] sm:$0xff] }
  0x12   : > { %1037 = vmatprep.subr.mxu0 %v1096_v0  ;;  %v213_v12 = vld [vmem:[%s1159_s23] sm:$0xff]  ;;  %v994_v20 = vld [vmem:[%s1138_s17 + $0x18] sm:$0xff]  ;;  %v981_v51 = vld [vmem:[%s1159_s23 + $0x8] sm:$0xff] }
  0x13   : > { %1028 = vmatpush3.msra.mxu1 %v213_v12  ;;  %v993_v21 = vld [vmem:[%s1144_s20 + $0x18] sm:$0xff]  ;;  %v988_v57 = vld [vmem:[%s1159_s23 + $0x10] sm:$0xff] }
  0x14   : > { %1025 = vmatmul.mubr.msk.f32.vlgmr.msra.gmra.mrb[0].mxu0 %vm214_vm1, %v211_v2  ;;  %1032 = vmatprep.subr.mxu1 %v1096_v0  ;;  %v995_v60 = vld [vmem:[%s1159_s23 + $0x18] sm:$0xff] }
  0x15   : > { %1039 = vmatprep.mubr.msk.f32.mxu0 %vm1097_vm0, %v1096_v0  ;;  %1038 = vmatpush3.msra.mxu0 %v981_v51 }
  0x16   : > { %1047 = vmatprep.subr.mxu0 %v1096_v0 }
  0xe7   : > { %v287_v3 = vpop.f32.mrb[0].mxu0 }
  0xe8   : > { %v291_v4 = vmul.f32 0.35355338, %v287_v3  ;;  %v1026_v5 = vpop.f32.mrb[1].mxu0 }
  0xea   : > { %v292_v6 = vsel %vm214_vm1, %v291_v4, -inf }
  0xeb   : > { %293 = vmax.xlane.f32.xlu0 %v292_v6 }
 0x178   : > { %v294_v7 = vpop.xlane.xlu0 %293 }
 0x179   : > { %v295_v8 = vsub.f32 %v291_v4, %v294_v7 }
 0x17b   : > { %v296_v9 = vmul.f32 1.442695, %v295_v8 }
 0x17d   : > { %1072 = vpow2.f32 %v296_v9 }
 0x187   : > { %v1073_v10 = vpop.eup %1072 }
 0x188   : > { %v298_v11 = vsel %vm214_vm1, %v1073_v10, 0.0 }
 0x189   : > { %299 = vadd.xlane.f32.xlu0 %v298_v11 }
 0x216   : > { %v300_v13 = vpop.xlane.xlu0 %299 }
 0x217   : > { %1074 = vrcp.f32 %v300_v13 }
 0x221   : > { %v1075_v14 = vpop.eup %1074 }
 0x222   : > { %v302_v15 = vmul.f32 %v1075_v14, %v1073_v10 }
 0x224   : > { %1030 = vmatmul.mubr.msk.f32.vlgmr.msra.gmra.mrb[0].mxu1 %vm214_vm1, %v302_v15 }
 0x225   : > { %1033 = vmatpush3.xpose.msk.msra.mxu1 %vm214_vm1, %v980_v16  ;;  %1034 = vmatprep.mubr.msk.f32.mxu1 %vm1097_vm0, %v1096_v0 }
 0x226   : > { %1042 = vmatprep.subr.mxu1 %v1096_v0 }
 0x228   : > { %1035 = vmatmul.mubr.msk.f32.vlgmr.msra.gmra.mrb[2].mxu1 %vm214_vm1, %v979_v17 }
 0x229   : > { %1043 = vmatpush3.xpose.msk.msra.mxu1 %vm214_vm1, %v987_v18  ;;  %1044 = vmatprep.mubr.msk.f32.mxu1 %vm1097_vm0, %v1096_v0 }
 0x22a   : > { %1052 = vmatprep.subr.mxu1 %v1096_v0 }
 0x22c   : > { %1045 = vmatmul.mubr.msk.f32.vlgmr.msra.gmra.mrb[4].mxu1 %vm214_vm1, %v986_v19 }
 0x22d   : > { %1053 = vmatpush3.xpose.msk.msra.mxu1 %vm214_vm1, %v994_v20  ;;  %1054 = vmatprep.mubr.msk.f32.mxu1 %vm1097_vm0, %v1096_v0 }
 0x230   : > { %1055 = vmatmul.mubr.msk.f32.vlgmr.msra.gmra.mrb[6].mxu1 %vm214_vm1, %v993_v21 }
 0x2f7   : > { %v372_v22 = vpop.f32.mrb[0].mxu1 }
 0x2f8   : > { %376 = vst.msk [vmem:[%s1188_s26] sm:$0xff] %vm214_vm1, %v372_v22  ;;  %v1031_v23 = vpop.f32.mrb[1].mxu1 }
 0x2fb   : > { %v455_v24 = vpop.f32.mrb[2].mxu1 }
 0x2fc   : > { %v459_v25 = vmul.f32 0.35355338, %v455_v24  ;;  %v1036_v26 = vpop.f32.mrb[3].mxu1 }
 0x2fe   : > { %v460_v27 = vsel %vm214_vm1, %v459_v25, -inf }
 0x2ff   : > { %461 = vmax.xlane.f32.xlu1 %v460_v27  ;;  %v624_v28 = vpop.f32.mrb[4].mxu1 }
 0x300   : > { %v628_v29 = vmul.f32 0.35355338, %v624_v28  ;;  %v1046_v30 = vpop.f32.mrb[5].mxu1 }
 0x302   : > { %v629_v31 = vsel %vm214_vm1, %v628_v29, -inf }
 0x303   : > { %630 = vmax.xlane.f32.xlu1 %v629_v31  ;;  %v793_v32 = vpop.f32.mrb[6].mxu1 }
 0x304   : > { %v797_v33 = vmul.f32 0.35355338, %v793_v32  ;;  %v1056_v34 = vpop.f32.mrb[7].mxu1 }
 0x306   : > { %v798_v35 = vsel %vm214_vm1, %v797_v33, -inf }
 0x307   : > { %799 = vmax.xlane.f32.xlu0 %v798_v35 }
 0x38c   : > { %v462_v36 = vpop.xlane.xlu1 %461 }
 0x38d   : > { %v463_v37 = vsub.f32 %v459_v25, %v462_v36 }
 0x38f   : > { %v464_v38 = vmul.f32 1.442695, %v463_v37 }
 0x390   : > { %v631_v39 = vpop.xlane.xlu1 %630 }
 0x391   : > { %1076 = vpow2.f32 %v464_v38  ;;  %v632_v40 = vsub.f32 %v628_v29, %v631_v39 }
 0x393   : > { %v633_v41 = vmul.f32 1.442695, %v632_v40 }
 0x394   : > { %v800_v42 = vpop.xlane.xlu0 %799 }
 0x395   : > { %1078 = vpow2.f32 %v633_v41  ;;  %v801_v43 = vsub.f32 %v797_v33, %v800_v42 }
 0x397   : > { %v802_v44 = vmul.f32 1.442695, %v801_v43 }
 0x399   : > { %1080 = vpow2.f32 %v802_v44 }
 0x39b   : > { %v1077_v45 = vpop.eup %1076 }
 0x39c   : > { %v466_v46 = vsel %vm214_vm1, %v1077_v45, 0.0 }
 0x39d   : > { %467 = vadd.xlane.f32.xlu1 %v466_v46 }
 0x39f   : > { %v1079_v47 = vpop.eup %1078 }
 0x3a0   : > { %v635_v48 = vsel %vm214_vm1, %v1079_v47, 0.0 }
 0x3a1   : > { %636 = vadd.xlane.f32.xlu0 %v635_v48 }
 0x3a3   : > { %v1081_v49 = vpop.eup %1080 }
 0x3a4   : > { %v804_v50 = vsel %vm214_vm1, %v1081_v49, 0.0 }
 0x3a5   : > { %805 = vadd.xlane.f32.xlu1 %v804_v50 }
 0x42a   : > { %v468_v52 = vpop.xlane.xlu1 %467 }
 0x42b   : > { %1082 = vrcp.f32 %v468_v52 }
 0x42e   : > { %v637_v53 = vpop.xlane.xlu0 %636 }
 0x42f   : > { %1084 = vrcp.f32 %v637_v53 }
 0x432   : > { %v806_v54 = vpop.xlane.xlu1 %805 }
 0x433   : > { %1086 = vrcp.f32 %v806_v54 }
 0x435   : > { %v1083_v55 = vpop.eup %1082 }
 0x436   : > { %v470_v56 = vmul.f32 %v1083_v55, %v1077_v45 }
 0x438   : > { %1040 = vmatmul.mubr.msk.f32.vlgmr.msra.gmra.mrb[2].mxu0 %vm214_vm1, %v470_v56 }
 0x439   : > { %v1085_v58 = vpop.eup %1084  ;;  %1048 = vmatpush3.msra.mxu0 %v988_v57  ;;  %1049 = vmatprep.mubr.msk.f32.mxu0 %vm1097_vm0, %v1096_v0 }
 0x43a   : > { %v639_v59 = vmul.f32 %v1085_v58, %v1079_v47  ;;  %1057 = vmatprep.subr.mxu0 %v1096_v0 }
 0x43c   : > { %1050 = vmatmul.mubr.msk.f32.vlgmr.msra.gmra.mrb[4].mxu0 %vm214_vm1, %v639_v59 }
 0x43d   : > { %v1087_v61 = vpop.eup %1086  ;;  %1058 = vmatpush3.msra.mxu0 %v995_v60  ;;  %1059 = vmatprep.mubr.msk.f32.mxu0 %vm1097_vm0, %v1096_v0 }
 0x43e   : > { %v808_v62 = vmul.f32 %v1087_v61, %v1081_v49 }
 0x440   : > { %1060 = vmatmul.mubr.msk.f32.vlgmr.msra.gmra.mrb[6].mxu0 %vm214_vm1, %v808_v62 }
 0x50b   : > { %v540_v63 = vpop.f32.mrb[2].mxu0 }
 0x50c   : > { %985 = vst.msk [vmem:[%s1188_s26 + $0x8] sm:$0xff] %vm214_vm1, %v540_v63  ;;  %v1041_v1 = vpop.f32.mrb[3].mxu0 }
 0x50f   : > { %v709_v2 = vpop.f32.mrb[4].mxu0 }
 0x510   : > { %992 = vst.msk [vmem:[%s1188_s26 + $0x10] sm:$0xff] %vm214_vm1, %v709_v2  ;;  %v1051_v3 = vpop.f32.mrb[5].mxu0 }
 0x513   : > { %v878_v4 = vpop.f32.mrb[6].mxu0 }
 0x514   : > { %999 = vst.msk [vmem:[%s1188_s26 + $0x18] sm:$0xff] %vm214_vm1, %v878_v4  ;;  %v1061_v5 = vpop.f32.mrb[7].mxu0 }
 0x515 PF: > { %s13_s12 = sadd.s32 1, %s1094_s12  }
 0x516   : > { %p10_p4 = scmp.ge.s32.totalorder %s13_s12, 4  }
 0x518   :  { %12 = sbr.rel (!%p10_p4) target bundleno = 1 (0x1), region = 80 }

</bundles_post_ra>
